<compile_context>
chip_gen: v7x
topology: tpu7x:2x2x1
jax: 0.10.0
libtpu: 0.0.40
codegen_flags: <defaults>
</compile_context>

<pallas_src>
import functools
import math

import jax
import jax.numpy as jnp
from jax.experimental import pallas as pl
from jax.experimental.pallas import tpu as pltpu


# ----------------------------------------------------------------------------
# Pallas kernel: full forward (encoder -> VAE sample -> decoder -> losses)
# ----------------------------------------------------------------------------
def _vae_kernel(
    # inputs
    x_ref, eps_ref,                                            # (BT,F), (BT,L)
    ew1_ref, eb1_ref, ew2_ref, eb2_ref, ew3_ref, eb3_ref,      # encoder convs (3Cin,Cout)
    hw_ref, hb_ref,                                            # fused mu|logvar head
    dw1_ref, db1_ref, dw2_ref, db2_ref, dw3_ref, db3_ref,      # decoder convs
    # outputs
    out_ref,                                                   # (BT, F)
    loss_ref,                                                  # (3,) SMEM: recons, kl, total
    *, T, lam_recons, lam_kl,
):
    BT, F = x_ref.shape
    L = eps_ref.shape[-1]

    # Hoisted per-row boundary masks (zero the rows whose t-1 / t+1 neighbor
    # falls outside the sample: conv zero-padding AND batch-seam rows).
    row = jax.lax.broadcasted_iota(jnp.int32, (BT, 1), 0)
    pos = row % T
    not_first = (pos != 0).astype(jnp.float32)       # (BT, 1)
    not_last = (pos != T - 1).astype(jnp.float32)    # (BT, 1)

    def conv1d_same3(h, w_ref, b_ref):
        # h: (BT, Cin); w_ref: (3*Cin, Cout) packed [w_tap0; w_tap1; w_tap2];
        # b_ref: (1, Cout).  One fused MXU matmul per conv layer.
        h_prev = pltpu.roll(h, 1, 0) * not_first          # h[t-1], zero-padded
        h_next = pltpu.roll(h, BT - 1, 0) * not_last      # h[t+1], zero-padded
        taps = jnp.concatenate([h_prev, h, h_next], axis=1)   # (BT, 3*Cin)
        y = jnp.dot(taps, w_ref[...], preferred_element_type=jnp.float32)
        return y + b_ref[...]

    def relu(h):
        return jnp.maximum(h, 0.0)

    x = x_ref[...].astype(jnp.float32)       # (BT, F)
    eps = eps_ref[...].astype(jnp.float32)   # (BT, L)

    # ---- encoder (Conv1DEncoder) ----
    h = relu(conv1d_same3(x, ew1_ref, eb1_ref))
    h = relu(conv1d_same3(h, ew2_ref, eb2_ref))
    enc = conv1d_same3(h, ew3_ref, eb3_ref)          # (BT, width) == latent.permute(0,2,1)

    # ---- fused VAE head: [mu | logvar] in one matmul, then rsample ----
    head = jnp.dot(enc, hw_ref[...], preferred_element_type=jnp.float32) + hb_ref[...]
    mu = head[:, :L]
    logvar = head[:, L:]
    var = jnp.exp(logvar)                            # reused for std and KL
    std = jnp.sqrt(var)                              # == exp(0.5*logvar)
    z = mu + eps * std                               # distribution.rsample()

    # ---- decoder (Conv1DDecoder) ----
    h = relu(conv1d_same3(z, dw1_ref, db1_ref))
    h = relu(conv1d_same3(h, dw2_ref, db2_ref))
    out = conv1d_same3(h, dw3_ref, db3_ref)          # (BT, F)

    out_ref[...] = out.astype(out_ref.dtype)

    # ---- losses ----
    diff = x - out
    recons = jnp.sum(diff * diff) / jnp.float32(BT * F)   # nn.MSELoss() mean reduction
    # KL(N(mu,std) || N(0,1)) elementwise = 0.5*(var + mu^2 - 1 - logvar), then mean
    kl = jnp.sum(0.5 * (var + mu * mu - 1.0 - logvar)) / jnp.float32(BT * L)

    loss_ref[0] = recons
    loss_ref[1] = kl
    loss_ref[2] = lam_recons * recons + lam_kl * kl


# ----------------------------------------------------------------------------
# Wrapper (glue): weight packing + pallas_call plumbing
# ----------------------------------------------------------------------------
def single_modality_vae_forward(x, eps, params, lambdas):
    """Runs the fused forward pass.  Returns (out, total_loss, loss_dict)."""
    B, T, F = x.shape
    L = eps.shape[-1]
    BT = B * T

    def pack_conv(w):
        # (3, Cin, Cout) -> (3*Cin, Cout); row-major so tap order matches
        # the [h[t-1] | h[t] | h[t+1]] activation concat in the kernel.
        return w.reshape(-1, w.shape[-1])

    head_w = jnp.concatenate([params["mw"], params["lw"]], axis=1)   # (width, 2L)
    head_b = jnp.concatenate([params["mb"], params["lb"]], axis=1)   # (1, 2L)

    inputs = (
        x.reshape(BT, F), eps.reshape(BT, L),
        pack_conv(params["ew1"]), params["eb1"],
        pack_conv(params["ew2"]), params["eb2"],
        pack_conv(params["ew3"]), params["eb3"],
        head_w, head_b,
        pack_conv(params["dw1"]), params["db1"],
        pack_conv(params["dw2"]), params["db2"],
        pack_conv(params["dw3"]), params["db3"],
    )

    kernel = functools.partial(
        _vae_kernel,
        T=T,
        lam_recons=float(lambdas["recons"]),
        lam_kl=float(lambdas["kl"]),
    )

    vmem = pl.BlockSpec(memory_space=pltpu.MemorySpace.VMEM)
    smem = pl.BlockSpec(memory_space=pltpu.MemorySpace.SMEM)

    # TODO(synk): at realistic sizes (large T / width>=256) add a grid over
    # (B, T-tiles with a 1-row halo) marked "parallel" so it fits v7x's 64 MiB
    # VMEM and uses both TensorCores; at these toy shapes a grid-less call is
    # strictly cheaper.
    out_flat, losses = pl.pallas_call(
        kernel,
        out_shape=(
            jax.ShapeDtypeStruct((BT, F), jnp.float32),
            jax.ShapeDtypeStruct((3,), jnp.float32),
        ),
        in_specs=[vmem] * len(inputs),
        out_specs=(vmem, smem),
    )(*inputs)

    out = out_flat.reshape(B, T, F)
    loss_dict = {"recons": losses[0], "kl": losses[1]}
    return out, losses[2], loss_dict


# ----------------------------------------------------------------------------
# Deterministic synthetic parameter init (PyTorch-style fan-in uniform)
# ----------------------------------------------------------------------------
def _init_conv(key, cin, cout, k=3):
    kw, kb = jax.random.split(key)
    bound = 1.0 / math.sqrt(cin * k)
    w = jax.random.uniform(kw, (k, cin, cout), jnp.float32, -bound, bound)
    b = jax.random.uniform(kb, (1, cout), jnp.float32, -bound, bound)
    return w, b


def _init_linear(key, cin, cout):
    kw, kb = jax.random.split(key)
    bound = 1.0 / math.sqrt(cin)
    w = jax.random.uniform(kw, (cin, cout), jnp.float32, -bound, bound)
    b = jax.random.uniform(kb, (1, cout), jnp.float32, -bound, bound)
    return w, b


def make_params(key, nfeats, width, latent_dim):
    ks = jax.random.split(key, 8)
    p = {}
    # encoder: nfeats -> width -> width -> width (output channels == encoder.width, vae=True)
    p["ew1"], p["eb1"] = _init_conv(ks[0], nfeats, width)
    p["ew2"], p["eb2"] = _init_conv(ks[1], width, width)
    p["ew3"], p["eb3"] = _init_conv(ks[2], width, width)
    # VAE heads: Linear(width, latent_dim)
    p["mw"], p["mb"] = _init_linear(ks[3], width, latent_dim)
    p["lw"], p["lb"] = _init_linear(ks[4], width, latent_dim)
    # decoder: latent_dim -> width -> width -> nfeats
    p["dw1"], p["db1"] = _init_conv(ks[5], latent_dim, width)
    p["dw2"], p["db2"] = _init_conv(ks[6], width, width)
    p["dw3"], p["db3"] = _init_conv(ks[7], width, nfeats)
    return p


# TODO(synk): vq (quantizer) and modality=='neural' (softplus + sum-MSE) branches
# are not exercised in this configuration (vq=None, modality='motion').

if __name__ == "__main__":
    B, T, NFEATS, WIDTH, LATENT = 2, 16, 8, 32, 16
    lambdas = {"recons": 1.0, "kl": 1e-4}

    root = jax.random.PRNGKey(0)
    kx, keps, kparams = jax.random.split(root, 3)

    # batch['motion'] : (B, T, nfeats);  eps is the N(0,1) noise for rsample()
    x = jax.random.normal(kx, (B, T, NFEATS), jnp.float32)
    eps = jax.random.normal(keps, (B, T, LATENT), jnp.float32)
    params = make_params(kparams, NFEATS, WIDTH, LATENT)

    out, total_loss, loss_dict = single_modality_vae_forward(x, eps, params, lambdas)
    out = jax.block_until_ready(out)
    total_loss = jax.block_until_ready(total_loss)

    assert out.shape == (B, T, NFEATS)
    assert bool(jnp.isfinite(total_loss))
    assert all(bool(jnp.isfinite(v)) for v in loss_dict.values())

    print("KERNEL_OK")
</pallas_src>

<mosaic_0001>
module attributes {stable_mosaic.version = 11 : i64} {
  func.func @_vae_kernel(%arg0: memref<32x8xf32, #tpu.memory_space<vmem>>, %arg1: memref<32x16xf32, #tpu.memory_space<vmem>>, %arg2: memref<24x32xf32, #tpu.memory_space<vmem>>, %arg3: memref<1x32xf32, #tpu.memory_space<vmem>>, %arg4: memref<96x32xf32, #tpu.memory_space<vmem>>, %arg5: memref<1x32xf32, #tpu.memory_space<vmem>>, %arg6: memref<96x32xf32, #tpu.memory_space<vmem>>, %arg7: memref<1x32xf32, #tpu.memory_space<vmem>>, %arg8: memref<32x32xf32, #tpu.memory_space<vmem>>, %arg9: memref<1x32xf32, #tpu.memory_space<vmem>>, %arg10: memref<48x32xf32, #tpu.memory_space<vmem>>, %arg11: memref<1x32xf32, #tpu.memory_space<vmem>>, %arg12: memref<96x32xf32, #tpu.memory_space<vmem>>, %arg13: memref<1x32xf32, #tpu.memory_space<vmem>>, %arg14: memref<96x8xf32, #tpu.memory_space<vmem>>, %arg15: memref<1x8xf32, #tpu.memory_space<vmem>>, %arg16: memref<32x8xf32, #tpu.memory_space<vmem>>, %arg17: memref<3xf32, #tpu.memory_space<smem>>) attributes {dimension_semantics = [], scalar_prefetch = 0 : i64, scratch_operands = 0 : i64, tpu.core_type = #tpu.core_type<tc>} {
    %0 = tpu.iota {dimensions = array<i32: 0>} : vector<32x1xi32>
    %c16_i32 = arith.constant 16 : i32
    %c0_i32 = arith.constant 0 : i32
    %1 = arith.cmpi eq, %c16_i32, %c0_i32 : i32
    %c1_i32 = arith.constant 1 : i32
    %2 = arith.select %1, %c1_i32, %c16_i32 : i32
    %3 = vector.broadcast %2 : i32 to vector<32x1xi32>
    %4 = arith.remsi %0, %3 : vector<32x1xi32>
    %c0_i32_0 = arith.constant 0 : i32
    %5 = vector.broadcast %c0_i32_0 : i32 to vector<32x1xi32>
    %6 = arith.cmpi ne, %4, %5 : vector<32x1xi32>
    %c0_i32_1 = arith.constant 0 : i32
    %7 = vector.broadcast %c0_i32_1 : i32 to vector<32x1xi32>
    %8 = arith.cmpi slt, %4, %7 : vector<32x1xi32>
    %c0_i32_2 = arith.constant 0 : i32
    %9 = arith.cmpi slt, %2, %c0_i32_2 : i32
    %10 = vector.broadcast %9 : i1 to vector<32x1xi1>
    %11 = vector.broadcast %10 : vector<32x1xi1> to vector<32x1xi1>
    %12 = arith.xori %8, %11 : vector<32x1xi1>
    %13 = arith.andi %12, %6 : vector<32x1xi1>
    %14 = vector.broadcast %2 : i32 to vector<32x1xi32>
    %15 = arith.addi %4, %14 : vector<32x1xi32>
    %16 = arith.select %13, %15, %4 : vector<32x1xi1>, vector<32x1xi32>
    %c0_i32_3 = arith.constant 0 : i32
    %17 = vector.broadcast %c0_i32_3 : i32 to vector<32x1xi32>
    %18 = arith.cmpi ne, %16, %17 : vector<32x1xi32>
    %19 = arith.extui %18 : vector<32x1xi1> to vector<32x1xi32>
    %20 = arith.sitofp %19 : vector<32x1xi32> to vector<32x1xf32>
    %c15_i32 = arith.constant 15 : i32
    %21 = vector.broadcast %c15_i32 : i32 to vector<32x1xi32>
    %22 = arith.cmpi ne, %16, %21 : vector<32x1xi32>
    %23 = arith.extui %22 : vector<32x1xi1> to vector<32x1xi32>
    %24 = arith.sitofp %23 : vector<32x1xi32> to vector<32x1xf32>
    %c0 = arith.constant 0 : index
    %c0_4 = arith.constant 0 : index
    %25 = vector.load %arg0[%c0, %c0_4] : memref<32x8xf32, #tpu.memory_space<vmem>>, vector<32x8xf32>
    %c0_5 = arith.constant 0 : index
    %c0_6 = arith.constant 0 : index
    %26 = vector.load %arg1[%c0_5, %c0_6] : memref<32x16xf32, #tpu.memory_space<vmem>>, vector<32x16xf32>
    %c1_i32_7 = arith.constant 1 : i32
    %27 = tpu.dynamic_rotate %25 by %c1_i32_7 dim 0 : vector<32x8xf32>, i32 -> vector<32x8xf32>
    %28 = vector.broadcast %20 : vector<32x1xf32> to vector<32x8xf32>
    %29 = arith.mulf %27, %28 : vector<32x8xf32>
    %c31_i32 = arith.constant 31 : i32
    %30 = tpu.dynamic_rotate %25 by %c31_i32 dim 0 : vector<32x8xf32>, i32 -> vector<32x8xf32>
    %31 = vector.broadcast %24 : vector<32x1xf32> to vector<32x8xf32>
    %32 = arith.mulf %30, %31 : vector<32x8xf32>
    %33 = tpu.concatenate %29, %25, %32 in 1 : vector<32x8xf32>, vector<32x8xf32>, vector<32x8xf32> -> vector<32x24xf32>
    %c0_8 = arith.constant 0 : index
    %c0_9 = arith.constant 0 : index
    %34 = vector.load %arg2[%c0_8, %c0_9] : memref<24x32xf32, #tpu.memory_space<vmem>>, vector<24x32xf32>
    %cst = arith.constant dense<0.000000e+00> : vector<32x32xf32>
    %35 = tpu.matmul %33, %34, %cst {dimension_numbers = #tpu.dot_dimension_numbers<[1], [0], [0], [1], [0, 0, 1, 1], [], []>} : vector<32x24xf32>, vector<24x32xf32>, vector<32x32xf32> -> vector<32x32xf32>
    %c0_10 = arith.constant 0 : index
    %c0_11 = arith.constant 0 : index
    %36 = vector.load %arg3[%c0_10, %c0_11] : memref<1x32xf32, #tpu.memory_space<vmem>>, vector<1x32xf32>
    %37 = vector.broadcast %36 : vector<1x32xf32> to vector<32x32xf32>
    %38 = arith.addf %35, %37 : vector<32x32xf32>
    %cst_12 = arith.constant 0.000000e+00 : f32
    %39 = vector.broadcast %cst_12 : f32 to vector<32x32xf32>
    %40 = arith.maximumf %38, %39 : vector<32x32xf32>
    %c1_i32_13 = arith.constant 1 : i32
    %41 = tpu.dynamic_rotate %40 by %c1_i32_13 dim 0 : vector<32x32xf32>, i32 -> vector<32x32xf32>
    %42 = vector.broadcast %20 : vector<32x1xf32> to vector<32x32xf32>
    %43 = arith.mulf %41, %42 : vector<32x32xf32>
    %c31_i32_14 = arith.constant 31 : i32
    %44 = tpu.dynamic_rotate %40 by %c31_i32_14 dim 0 : vector<32x32xf32>, i32 -> vector<32x32xf32>
    %45 = vector.broadcast %24 : vector<32x1xf32> to vector<32x32xf32>
    %46 = arith.mulf %44, %45 : vector<32x32xf32>
    %47 = tpu.concatenate %43, %40, %46 in 1 : vector<32x32xf32>, vector<32x32xf32>, vector<32x32xf32> -> vector<32x96xf32>
    %c0_15 = arith.constant 0 : index
    %c0_16 = arith.constant 0 : index
    %48 = vector.load %arg4[%c0_15, %c0_16] : memref<96x32xf32, #tpu.memory_space<vmem>>, vector<96x32xf32>
    %cst_17 = arith.constant dense<0.000000e+00> : vector<32x32xf32>
    %49 = tpu.matmul %47, %48, %cst_17 {dimension_numbers = #tpu.dot_dimension_numbers<[1], [0], [0], [1], [0, 0, 1, 1], [], []>} : vector<32x96xf32>, vector<96x32xf32>, vector<32x32xf32> -> vector<32x32xf32>
    %c0_18 = arith.constant 0 : index
    %c0_19 = arith.constant 0 : index
    %50 = vector.load %arg5[%c0_18, %c0_19] : memref<1x32xf32, #tpu.memory_space<vmem>>, vector<1x32xf32>
    %51 = vector.broadcast %50 : vector<1x32xf32> to vector<32x32xf32>
    %52 = arith.addf %49, %51 : vector<32x32xf32>
    %cst_20 = arith.constant 0.000000e+00 : f32
    %53 = vector.broadcast %cst_20 : f32 to vector<32x32xf32>
    %54 = arith.maximumf %52, %53 : vector<32x32xf32>
    %c1_i32_21 = arith.constant 1 : i32
    %55 = tpu.dynamic_rotate %54 by %c1_i32_21 dim 0 : vector<32x32xf32>, i32 -> vector<32x32xf32>
    %56 = vector.broadcast %20 : vector<32x1xf32> to vector<32x32xf32>
    %57 = arith.mulf %55, %56 : vector<32x32xf32>
    %c31_i32_22 = arith.constant 31 : i32
    %58 = tpu.dynamic_rotate %54 by %c31_i32_22 dim 0 : vector<32x32xf32>, i32 -> vector<32x32xf32>
    %59 = vector.broadcast %24 : vector<32x1xf32> to vector<32x32xf32>
    %60 = arith.mulf %58, %59 : vector<32x32xf32>
    %61 = tpu.concatenate %57, %54, %60 in 1 : vector<32x32xf32>, vector<32x32xf32>, vector<32x32xf32> -> vector<32x96xf32>
    %c0_23 = arith.constant 0 : index
    %c0_24 = arith.constant 0 : index
    %62 = vector.load %arg6[%c0_23, %c0_24] : memref<96x32xf32, #tpu.memory_space<vmem>>, vector<96x32xf32>
    %cst_25 = arith.constant dense<0.000000e+00> : vector<32x32xf32>
    %63 = tpu.matmul %61, %62, %cst_25 {dimension_numbers = #tpu.dot_dimension_numbers<[1], [0], [0], [1], [0, 0, 1, 1], [], []>} : vector<32x96xf32>, vector<96x32xf32>, vector<32x32xf32> -> vector<32x32xf32>
    %c0_26 = arith.constant 0 : index
    %c0_27 = arith.constant 0 : index
    %64 = vector.load %arg7[%c0_26, %c0_27] : memref<1x32xf32, #tpu.memory_space<vmem>>, vector<1x32xf32>
    %65 = vector.broadcast %64 : vector<1x32xf32> to vector<32x32xf32>
    %66 = arith.addf %63, %65 : vector<32x32xf32>
    %c0_28 = arith.constant 0 : index
    %c0_29 = arith.constant 0 : index
    %67 = vector.load %arg8[%c0_28, %c0_29] : memref<32x32xf32, #tpu.memory_space<vmem>>, vector<32x32xf32>
    %cst_30 = arith.constant dense<0.000000e+00> : vector<32x32xf32>
    %68 = tpu.matmul %66, %67, %cst_30 {dimension_numbers = #tpu.dot_dimension_numbers<[1], [0], [0], [1], [0, 0, 1, 1], [], []>} : vector<32x32xf32>, vector<32x32xf32>, vector<32x32xf32> -> vector<32x32xf32>
    %c0_31 = arith.constant 0 : index
    %c0_32 = arith.constant 0 : index
    %69 = vector.load %arg9[%c0_31, %c0_32] : memref<1x32xf32, #tpu.memory_space<vmem>>, vector<1x32xf32>
    %70 = vector.broadcast %69 : vector<1x32xf32> to vector<32x32xf32>
    %71 = arith.addf %68, %70 : vector<32x32xf32>
    %72 = vector.extract_strided_slice %71 {offsets = [0, 0], sizes = [32, 16], strides = [1, 1]} : vector<32x32xf32> to vector<32x16xf32>
    %73 = vector.extract_strided_slice %71 {offsets = [0, 16], sizes = [32, 16], strides = [1, 1]} : vector<32x32xf32> to vector<32x16xf32>
    %74 = math.exp %73 : vector<32x16xf32>
    %75 = math.sqrt %74 : vector<32x16xf32>
    %76 = arith.mulf %26, %75 : vector<32x16xf32>
    %77 = arith.addf %72, %76 : vector<32x16xf32>
    %c1_i32_33 = arith.constant 1 : i32
    %78 = tpu.dynamic_rotate %77 by %c1_i32_33 dim 0 : vector<32x16xf32>, i32 -> vector<32x16xf32>
    %79 = vector.broadcast %20 : vector<32x1xf32> to vector<32x16xf32>
    %80 = arith.mulf %78, %79 : vector<32x16xf32>
    %c31_i32_34 = arith.constant 31 : i32
    %81 = tpu.dynamic_rotate %77 by %c31_i32_34 dim 0 : vector<32x16xf32>, i32 -> vector<32x16xf32>
    %82 = vector.broadcast %24 : vector<32x1xf32> to vector<32x16xf32>
    %83 = arith.mulf %81, %82 : vector<32x16xf32>
    %84 = tpu.concatenate %80, %77, %83 in 1 : vector<32x16xf32>, vector<32x16xf32>, vector<32x16xf32> -> vector<32x48xf32>
    %c0_35 = arith.constant 0 : index
    %c0_36 = arith.constant 0 : index
    %85 = vector.load %arg10[%c0_35, %c0_36] : memref<48x32xf32, #tpu.memory_space<vmem>>, vector<48x32xf32>
    %cst_37 = arith.constant dense<0.000000e+00> : vector<32x32xf32>
    %86 = tpu.matmul %84, %85, %cst_37 {dimension_numbers = #tpu.dot_dimension_numbers<[1], [0], [0], [1], [0, 0, 1, 1], [], []>} : vector<32x48xf32>, vector<48x32xf32>, vector<32x32xf32> -> vector<32x32xf32>
    %c0_38 = arith.constant 0 : index
    %c0_39 = arith.constant 0 : index
    %87 = vector.load %arg11[%c0_38, %c0_39] : memref<1x32xf32, #tpu.memory_space<vmem>>, vector<1x32xf32>
    %88 = vector.broadcast %87 : vector<1x32xf32> to vector<32x32xf32>
    %89 = arith.addf %86, %88 : vector<32x32xf32>
    %cst_40 = arith.constant 0.000000e+00 : f32
    %90 = vector.broadcast %cst_40 : f32 to vector<32x32xf32>
    %91 = arith.maximumf %89, %90 : vector<32x32xf32>
    %c1_i32_41 = arith.constant 1 : i32
    %92 = tpu.dynamic_rotate %91 by %c1_i32_41 dim 0 : vector<32x32xf32>, i32 -> vector<32x32xf32>
    %93 = vector.broadcast %20 : vector<32x1xf32> to vector<32x32xf32>
    %94 = arith.mulf %92, %93 : vector<32x32xf32>
    %c31_i32_42 = arith.constant 31 : i32
    %95 = tpu.dynamic_rotate %91 by %c31_i32_42 dim 0 : vector<32x32xf32>, i32 -> vector<32x32xf32>
    %96 = vector.broadcast %24 : vector<32x1xf32> to vector<32x32xf32>
    %97 = arith.mulf %95, %96 : vector<32x32xf32>
    %98 = tpu.concatenate %94, %91, %97 in 1 : vector<32x32xf32>, vector<32x32xf32>, vector<32x32xf32> -> vector<32x96xf32>
    %c0_43 = arith.constant 0 : index
    %c0_44 = arith.constant 0 : index
    %99 = vector.load %arg12[%c0_43, %c0_44] : memref<96x32xf32, #tpu.memory_space<vmem>>, vector<96x32xf32>
    %cst_45 = arith.constant dense<0.000000e+00> : vector<32x32xf32>
    %100 = tpu.matmul %98, %99, %cst_45 {dimension_numbers = #tpu.dot_dimension_numbers<[1], [0], [0], [1], [0, 0, 1, 1], [], []>} : vector<32x96xf32>, vector<96x32xf32>, vector<32x32xf32> -> vector<32x32xf32>
    %c0_46 = arith.constant 0 : index
    %c0_47 = arith.constant 0 : index
    %101 = vector.load %arg13[%c0_46, %c0_47] : memref<1x32xf32, #tpu.memory_space<vmem>>, vector<1x32xf32>
    %102 = vector.broadcast %101 : vector<1x32xf32> to vector<32x32xf32>
    %103 = arith.addf %100, %102 : vector<32x32xf32>
    %cst_48 = arith.constant 0.000000e+00 : f32
    %104 = vector.broadcast %cst_48 : f32 to vector<32x32xf32>
    %105 = arith.maximumf %103, %104 : vector<32x32xf32>
    %c1_i32_49 = arith.constant 1 : i32
    %106 = tpu.dynamic_rotate %105 by %c1_i32_49 dim 0 : vector<32x32xf32>, i32 -> vector<32x32xf32>
    %107 = vector.broadcast %20 : vector<32x1xf32> to vector<32x32xf32>
    %108 = arith.mulf %106, %107 : vector<32x32xf32>
    %c31_i32_50 = arith.constant 31 : i32
    %109 = tpu.dynamic_rotate %105 by %c31_i32_50 dim 0 : vector<32x32xf32>, i32 -> vector<32x32xf32>
    %110 = vector.broadcast %24 : vector<32x1xf32> to vector<32x32xf32>
    %111 = arith.mulf %109, %110 : vector<32x32xf32>
    %112 = tpu.concatenate %108, %105, %111 in 1 : vector<32x32xf32>, vector<32x32xf32>, vector<32x32xf32> -> vector<32x96xf32>
    %c0_51 = arith.constant 0 : index
    %c0_52 = arith.constant 0 : index
    %113 = vector.load %arg14[%c0_51, %c0_52] : memref<96x8xf32, #tpu.memory_space<vmem>>, vector<96x8xf32>
    %cst_53 = arith.constant dense<0.000000e+00> : vector<32x8xf32>
    %114 = tpu.matmul %112, %113, %cst_53 {dimension_numbers = #tpu.dot_dimension_numbers<[1], [0], [0], [1], [0, 0, 1, 1], [], []>} : vector<32x96xf32>, vector<96x8xf32>, vector<32x8xf32> -> vector<32x8xf32>
    %c0_54 = arith.constant 0 : index
    %c0_55 = arith.constant 0 : index
    %115 = vector.load %arg15[%c0_54, %c0_55] : memref<1x8xf32, #tpu.memory_space<vmem>>, vector<1x8xf32>
    %116 = vector.broadcast %115 : vector<1x8xf32> to vector<32x8xf32>
    %117 = arith.addf %114, %116 : vector<32x8xf32>
    %c0_56 = arith.constant 0 : index
    %c0_57 = arith.constant 0 : index
    %118 = vector.load %arg16[%c0_56, %c0_57] : memref<32x8xf32, #tpu.memory_space<vmem>>, vector<32x8xf32>
    tpu.vector_store %arg16[%c0_56, %c0_57], %117 {strides = array<i32>} : memref<32x8xf32, #tpu.memory_space<vmem>>, vector<32x8xf32>,
    %119 = arith.subf %25, %117 : vector<32x8xf32>
    %120 = arith.mulf %119, %119 : vector<32x8xf32>
    %121 = vector.shape_cast %120 : vector<32x8xf32> to vector<1x32x8xf32>
    %cst_58 = arith.constant dense<0.000000e+00> : vector<1xf32>
    %122 = vector.multi_reduction <add>, %121, %cst_58 [1, 2] : vector<1x32x8xf32> to vector<1xf32>
    %123 = vector.shape_cast %122 : vector<1xf32> to vector<1x1x1xf32>
    %124 = vector.extract %123[0, 0, 0] : f32 from vector<1x1x1xf32>
    %cst_59 = arith.constant 2.560000e+02 : f32
    %125 = arith.divf %124, %cst_59 : f32
    %126 = arith.mulf %72, %72 : vector<32x16xf32>
    %127 = arith.addf %74, %126 : vector<32x16xf32>
    %cst_60 = arith.constant 1.000000e+00 : f32
    %128 = vector.broadcast %cst_60 : f32 to vector<32x16xf32>
    %129 = arith.subf %127, %128 : vector<32x16xf32>
    %130 = arith.subf %129, %73 : vector<32x16xf32>
    %cst_61 = arith.constant 5.000000e-01 : f32
    %131 = vector.broadcast %cst_61 : f32 to vector<32x16xf32>
    %132 = arith.mulf %131, %130 : vector<32x16xf32>
    %133 = vector.shape_cast %132 : vector<32x16xf32> to vector<1x32x16xf32>
    %cst_62 = arith.constant dense<0.000000e+00> : vector<1xf32>
    %134 = vector.multi_reduction <add>, %133, %cst_62 [1, 2] : vector<1x32x16xf32> to vector<1xf32>
    %135 = vector.shape_cast %134 : vector<1xf32> to vector<1x1x1xf32>
    %136 = vector.extract %135[0, 0, 0] : f32 from vector<1x1x1xf32>
    %cst_63 = arith.constant 5.120000e+02 : f32
    %137 = arith.divf %136, %cst_63 : f32
    %c0_64 = arith.constant 0 : index
    %138 = memref.load %arg17[%c0_64] : memref<3xf32, #tpu.memory_space<smem>>
    memref.store %125, %arg17[%c0_64] : memref<3xf32, #tpu.memory_space<smem>>
    %c1 = arith.constant 1 : index
    %139 = memref.load %arg17[%c1] : memref<3xf32, #tpu.memory_space<smem>>
    memref.store %137, %arg17[%c1] : memref<3xf32, #tpu.memory_space<smem>>
    %cst_65 = arith.constant 1.000000e+00 : f32
    %140 = arith.mulf %cst_65, %125 : f32
    %cst_66 = arith.constant 9.99999974E-5 : f32
    %141 = arith.mulf %cst_66, %137 : f32
    %142 = arith.addf %140, %141 : f32
    %c2 = arith.constant 2 : index
    %143 = memref.load %arg17[%c2] : memref<3xf32, #tpu.memory_space<smem>>
    memref.store %142, %arg17[%c2] : memref<3xf32, #tpu.memory_space<smem>>
    return
  }
}

</mosaic_0001>

<bundles_post_ra>
// kernel: tpu_custom_call.1
= control target key start
LH: loop header
LB: loop body
LE: loop exit
PB: predicated region body
PF: predicated region fallthrough
CT: control target
= control target key end

     0   :  { %s2714_s0 = inlined_call_operand.vmem [shape: f32[32,8], index: 0, kind: input, shape index: {}]   ;;  %s2715_s1 = inlined_call_operand.vmem [shape: f32[32,16], index: 1, kind: input, shape index: {}]   ;;  %s2716_s2 = inlined_call_operand.vmem [shape: f32[24,32], index: 2, kind: input, shape index: {}]   ;;  %s2717_s3 = inlined_call_operand.vmem [shape: f32[1,32], index: 3, kind: input, shape index: {}]   ;;  %s2718_s4 = inlined_call_operand.vmem [shape: f32[96,32], index: 4, kind: input, shape index: {}]   ;;  %s2719_s5 = inlined_call_operand.vmem [shape: f32[1,32], index: 5, kind: input, shape index: {}]   ;;  %s2720_s6 = inlined_call_operand.vmem [shape: f32[96,32], index: 6, kind: input, shape index: {}]   ;;  %s2721_s7 = inlined_call_operand.vmem [shape: f32[1,32], index: 7, kind: input, shape index: {}]   ;;  %s2722_s8 = inlined_call_operand.vmem [shape: f32[32,32], index: 8, kind: input, shape index: {}]   ;;  %s2723_s9 = inlined_call_operand.vmem [shape: f32[1,32], index: 9, kind: input, shape index: {}]   ;;  %s2724_s10 = inlined_call_operand.vmem [shape: f32[48,32], index: 10, kind: input, shape index: {}]   ;;  %s2725_s11 = inlined_call_operand.vmem [shape: f32[1,32], index: 11, kind: input, shape index: {}]   ;;  %s2726_s12 = inlined_call_operand.vmem [shape: f32[96,32], index: 12, kind: input, shape index: {}]   ;;  %s2727_s13 = inlined_call_operand.vmem [shape: f32[1,32], index: 13, kind: input, shape index: {}]   ;;  %s2728_s14 = inlined_call_operand.vmem [shape: f32[96,8], index: 14, kind: input, shape index: {}]   ;;  %s2729_s15 = inlined_call_operand.vmem [shape: f32[1,8], index: 15, kind: input, shape index: {}]   ;;  %s2730_s16 = inlined_call_operand.vmem [shape: f32[32,8], index: 16, kind: output, shape index: {0}]   ;;  %s2731_s17 = inlined_call_operand.hbm [shape: f32[3], index: 17, kind: output, shape index: {1}]  }
   0x1   :  { %2734 = sst [smem:[#allocation5_spill]] %s2714_s0 }
   0x2   :  { %2735 = sst [smem:[#allocation6_spill]] %s2715_s1 }
   0x3   :  { %s2736_s26 = sld [smem:[#allocation5_spill]]  ;;  %v56_v3 = vlaneseq  ;;  %s1985_s30 = smov 8   ;;  %v209_v6 = vld [vmem:[%s2716_s2] sm:$0xff]  ;;  %v210_v9 = vld [vmem:[%s2716_s2 + $0x8] sm:$0xff] }
   0x4   :  { %v1822_v11 = vpack.c.bf16 %v210_v9, %v209_v6 }
   0x5   :  { %v2110_v7 = vshrl.u32 %v56_v3, 7 }
   0x9   :  { %v2085_v0 = vld [vmem:[%s2736_s26] sm:$0xff]  ;;  %v2090_v1 = vld [vmem:[%s2736_s26 + $0x18] sm:$0xff]  ;;  %v2095_v2 = vld [vmem:[%s2736_s26 + $0x8] sm:$0xff] }
   0xa   :  { %171 = vrot.lane.b32.xlu0 %v2085_v0, %s1985_s30  ;;  %177 = vrot.lane.b32.xlu1 %v2090_v1, %s1985_s30  ;;  %v154_v4 = vrot.slane %v2085_v0, 1  ;;  %v2105_v5 = vld [vmem:[%s2736_s26 + $0x10] sm:$0xff]  ;;  %v155_v8 = vrot.slane %v2095_v2, 1 }
   0xb   :  { %v156_v10 = vrot.slane %v2105_v5, 1 }
   0xc   :  { %23 = vsyncpa [#allocation3], 0  ;;  %vm158_vm0 = vcmp.lt.s32.totalorder %v2110_v7, 7  ;;  %v58_v12 = vadd.s32 8, %v2110_v7  ;;  %v60_v13 = vadd.s32 24, %v2110_v7  ;;  %v65_v14 = vand.u32 15, %v2110_v7  ;;  %1823 = vmatprep.subr.bf16.mxu1 %v1822_v11 }
   0xd   :  { %v161_v15 = vsel %vm158_vm0, %v154_v4, %v155_v8  ;;  %v157_v16 = vrot.slane %v2090_v1, 1  ;;  %v211_v17 = vld [vmem:[%s2716_s2 + $0x10] sm:$0xff]  ;;  %s1986_s25 = smov 16   ;;  %v160_v20 = vsel %vm158_vm0, %v155_v8, %v156_v10  ;;  %v1987_v21 = vmov 0.0   ;;  %1825 = vmatpush3.bf16.msra.mxu1 %v1822_v11  ;;  %v387_v58 = vld [vmem:[%s2718_s4] sm:$0xff]  ;;  %v388_v59 = vld [vmem:[%s2718_s4 + $0x8] sm:$0xff] }
   0xe   :  { %173 = vrot.lane.b32.xlu0 %v2095_v2, %s1985_s30  ;;  %187 = vrot.lane.b32.xlu1 %v161_v15, %s1986_s25  ;;  %v72_v18 = vand.u32 15, %v58_v12  ;;  %v86_v19 = vand.u32 15, %v60_v13  ;;  %vm109_vm1 = vcmp.ne.s32.totalorder %v65_v14, 0  ;;  %v59_v26 = vadd.s32 16, %v2110_v7  ;;  %v389_v60 = vld [vmem:[%s2718_s4 + $0x10] sm:$0xff]  ;;  %v390_v62 = vld [vmem:[%s2718_s4 + $0x18] sm:$0xff] }
   0xf   :  { %v2132_v22 = vsel %vm109_vm1, 1.0, %v1987_v21  ;;  %1662 = vmatprep.subr.mxu1 %v211_v17  ;;  %v162_v25 = vsel %vm158_vm0, %v157_v16, %v154_v4  ;;  %v159_v28 = vsel %vm158_vm0, %v156_v10, %v157_v16  ;;  %v141_v32 = vrot.slane %v2085_v0, 7  ;;  %v391_v0 = vld [vmem:[%s2718_s4 + $0x20] sm:$0xff]  ;;  %v393_v3 = vld [vmem:[%s2718_s4 + $0x30] sm:$0xff]  ;;  %v394_v4 = vld [vmem:[%s2718_s4 + $0x38] sm:$0xff]  ;;  %s1988_s23 = smov 32  }
  0x10   :  { %vm122_vm2 = vcmp.ne.s32.totalorder %v72_v18, 15  ;;  %vm124_vm3 = vcmp.ne.s32.totalorder %v86_v19, 15  ;;  %v79_v29 = vand.u32 15, %v59_v26  ;;  %v144_v33 = vrot.slane %v2090_v1, 7  ;;  %v392_v1 = vld [vmem:[%s2718_s4 + $0x28] sm:$0xff]  ;;  %v395_v6 = vld [vmem:[%s2718_s4 + $0x40] sm:$0xff] }
  0x11   :  { %v2136_v23 = vsel %vm122_vm2, 1.0, %v1987_v21  ;;  %v2138_v24 = vsel %vm124_vm3, 1.0, %v1987_v21  ;;  %1663 = vmatpush3.msra.mxu1 %v211_v17  ;;  %vm145_vm5 = vcmp.lt.s32.totalorder %v2110_v7, 1  ;;  %v142_v37 = vrot.slane %v2095_v2, 7  ;;  %v396_v8 = vld [vmem:[%s2718_s4 + $0x48] sm:$0xff]  ;;  %v397_v10 = vld [vmem:[%s2718_s4 + $0x50] sm:$0xff] }
  0x12   :  { %175 = vrot.lane.b32.xlu0 %v2105_v5, %s1985_s30  ;;  %v164_v27 = vmul.f32 %v2136_v23, %v160_v20  ;;  %v166_v30 = vmul.f32 %v2138_v24, %v162_v25  ;;  %vm111_vm4 = vcmp.ne.s32.totalorder %v79_v29, 0  ;;  %v149_v34 = vsel %vm145_vm5, %v144_v33, %v141_v32  ;;  %v398_v11 = vld [vmem:[%s2718_s4 + $0x58] sm:$0xff]  ;;  %v1530_v12 = vld [vmem:[%s2717_s3] ss:$0 sm:$0xff]  ;;  %s1989_s3 = smov 64   ;;  %s2737_s4 = sld [smem:[#allocation6_spill]] }
  0x13   :  { %v2149_v31 = vsel %vm111_vm4, 1.0, %v1987_v21  ;;  %v143_v38 = vrot.slane %v2105_v5, 7  ;;  %v150_v39 = vmul.f32 %v2132_v22, %v149_v34  ;;  %vm199_vm6 = vcmask 64512  }
  0x14   :  { %189 = vrot.lane.b32.xlu1 %v164_v27, %s1986_s25  ;;  %vm204_vm7 = vcmask 130048   ;;  %vm219_vm8 = vcmask 195584   ;;  %v148_v46 = vsel %vm145_vm5, %v141_v32, %v142_v37  ;;  %v1826_v61 = vpack.c.bf16 %v388_v59, %v387_v58 }
  0x15   :  { %v147_v40 = vsel %vm145_vm5, %v142_v37, %v143_v38  ;;  %v146_v51 = vsel %vm145_vm5, %v143_v38, %v144_v33  ;;  %v1830_v63 = vpack.c.bf16 %v390_v62, %v389_v60  ;;  %v1834_v2 = vpack.c.bf16 %v392_v1, %v391_v0 }
  0x16   :  { %191 = vrot.lane.b32.xlu0 %v159_v28, %s1986_s25  ;;  %v152_v45 = vmul.f32 %v2149_v31, %v147_v40  ;;  %1827 = vmatprep.subr.bf16.mxu1 %v1826_v61  ;;  %v1838_v5 = vpack.c.bf16 %v394_v4, %v393_v3  ;;  %v1842_v9 = vpack.c.bf16 %v396_v8, %v395_v6  ;;  %vm377_vm9 = vcmask 261120   ;;  %v573_v3 = vld [vmem:[%s2720_s6 + $0x8] sm:$0xff]  ;;  %v574_v4 = vld [vmem:[%s2720_s6 + $0x10] sm:$0xff]  ;;  %v575_v6 = vld [vmem:[%s2720_s6 + $0x18] sm:$0xff] }
  0x17   :  { %v1846_v13 = vpack.c.bf16 %v398_v11, %v397_v10  ;;  %vm382_vm10 = vcmask 523264   ;;  %vm406_vm11 = vcmask 785408   ;;  %v1854_v8 = vpack.c.bf16 %v575_v6, %v574_v4  ;;  %v577_v10 = vld [vmem:[%s2720_s6 + $0x28] sm:$0xff] }
  0x18   :  { %193 = vrot.lane.b32.xlu1 %v166_v30, %s1986_s25 }
  0x7c   :  { %v172_v35 = vpop.permute.xlu0 %171  ;;  %v178_v36 = vpop.permute.xlu1 %177 }
  0x7d   :  { %v200_v42 = vsel %vm199_vm6, %v150_v39, %v172_v35  ;;  %v203_v55 = vsel %vm199_vm6, %v146_v51, %v178_v36 }
  0x80   :  { %v174_v41 = vpop.permute.xlu0 %173  ;;  %v188_v43 = vpop.permute.xlu1 %187 }
  0x81   :  { %v205_v44 = vsel %vm204_vm7, %v200_v42, %v188_v43  ;;  %v201_v49 = vsel %vm199_vm6, %v148_v46, %v174_v41 }
  0x82   :  { %1664 = vmatprep.mubr.msk.f32.mxu1 %vm219_vm8, %v205_v44 }
  0x84   :  { %v176_v47 = vpop.permute.xlu0 %175 }
  0x85   :  { %v202_v48 = vsel %vm199_vm6, %v152_v45, %v176_v47 }
  0x86   :  { %v190_v50 = vpop.permute.xlu1 %189 }
  0x87   :  { %v206_v52 = vsel %vm204_vm7, %v201_v49, %v190_v50 }
  0x88   :  { %v192_v53 = vpop.permute.xlu0 %191  ;;  %1665 = vmatmul.mubr.msk.f32.vlgmr.msra.gmra.mrb[0].mxu1 %vm219_vm8, %v206_v52 }
  0x89   :  { %v207_v54 = vsel %vm204_vm7, %v202_v48, %v192_v53  ;;  %1829 = vmatpush3.bf16.msra.mxu1 %v1826_v61 }
  0x8a   :  { %1667 = vmatprep.mubr.msk.f32.mxu1 %vm219_vm8, %v207_v54  ;;  %v194_v56 = vpop.permute.xlu1 %193  ;;  %1831 = vmatprep.subr.bf16.mxu1 %v1830_v63 }
  0x8b   :  { %v208_v57 = vsel %vm204_vm7, %v203_v55, %v194_v56 }
  0x8c   :  { %1668 = vmatmul.mubr.msk.f32.gmra.mrb[2].mxu1 %vm219_vm8, %v208_v57  ;;  %vm933_vm8 = vcmask 392192  }
  0x8d   :  { %1833 = vmatpush3.bf16.msra.mxu1 %v1830_v63 }
  0x8e   :  { %1835 = vmatprep.subr.bf16.mxu1 %v1834_v2 }
  0x91   :  { %1837 = vmatpush3.bf16.msra.mxu1 %v1834_v2  ;;  %v572_v2 = vld [vmem:[%s2720_s6] sm:$0xff] }
  0x92   :  { %1839 = vmatprep.subr.bf16.mxu1 %v1838_v5 }
  0x95   :  { %1841 = vmatpush3.bf16.msra.mxu1 %v1838_v5  ;;  %v1850_v5 = vpack.c.bf16 %v573_v3, %v572_v2 }
  0x96   :  { %1843 = vmatprep.subr.bf16.mxu1 %v1842_v9 }
  0x97   :  { %1851 = vmatprep.subr.bf16.mxu0 %v1850_v5 }
  0x98   :  { %1853 = vmatpush3.bf16.msra.mxu0 %v1850_v5 }
  0x99   :  { %1845 = vmatpush3.bf16.msra.mxu1 %v1842_v9  ;;  %v576_v9 = vld [vmem:[%s2720_s6 + $0x20] sm:$0xff]  ;;  %1855 = vmatprep.subr.bf16.mxu0 %v1854_v8 }
  0x9a   :  { %1847 = vmatprep.subr.bf16.mxu1 %v1846_v13  ;;  %v1858_v11 = vpack.c.bf16 %v577_v10, %v576_v9 }
  0x9c   :  { %1857 = vmatpush3.bf16.msra.mxu0 %v1854_v8 }
  0x9d   :  { %1849 = vmatpush3.bf16.msra.mxu1 %v1846_v13  ;;  %v579_v13 = vld [vmem:[%s2720_s6 + $0x38] sm:$0xff]  ;;  %1859 = vmatprep.subr.bf16.mxu0 %v1858_v11 }
  0xa0   :  { %1861 = vmatpush3.bf16.msra.mxu0 %v1858_v11 }
 0x15b   :  { %v1666_v14 = vpop.f32.mrb[0].mxu1 }
 0x15c   :  { %v304_v15 = vadd.f32 %v1666_v14, %v1530_v12  ;;  %v298_v16 = vpop.f32.mrb[1].mxu1 }
 0x15d   :  { %v299_v17 = vadd.f32 %v1530_v12, %v298_v16  ;;  %v581_v16 = vld [vmem:[%s2720_s6 + $0x48] sm:$0xff] }
 0x15e   :  { %v318_v18 = vmax.f32 %v304_v15, 0.0  ;;  %v580_v15 = vld [vmem:[%s2720_s6 + $0x40] sm:$0xff] }
 0x15f   :  { %v317_v19 = vmax.f32 %v299_v17, 0.0  ;;  %v1669_v20 = vpop.f32.mrb[2].mxu1  ;;  %v1866_v17 = vpack.c.bf16 %v581_v16, %v580_v15  ;;  %v691_v15 = vld [vmem:[%s2722_s8 + $0x18] sm:$0xff] }
 0x160   :  { %v322_v21 = vrot.slane %v318_v18, 7  ;;  %v334_v25 = vrot.slane %v318_v18, 1  ;;  %v314_v26 = vadd.f32 %v1669_v20, %v1530_v12  ;;  %351 = vrot.lane.b32.xlu1 %v318_v18, %s1988_s23  ;;  %v308_v27 = vpop.f32.mrb[3].mxu1  ;;  %v582_v18 = vld [vmem:[%s2720_s6 + $0x50] sm:$0xff]  ;;  %v1535_v20 = vld [vmem:[%s2719_s5] ss:$0 sm:$0xff] }
 0x161   :  { %v321_v28 = vrot.slane %v317_v19, 7  ;;  %v333_v29 = vrot.slane %v317_v19, 1  ;;  %v309_v30 = vadd.f32 %v1530_v12, %v308_v27  ;;  %349 = vrot.lane.b32.xlu0 %v317_v19, %s1988_s23  ;;  %v578_v12 = vld [vmem:[%s2720_s6 + $0x30] sm:$0xff]  ;;  %v583_v19 = vld [vmem:[%s2720_s6 + $0x58] sm:$0xff] }
 0x162   :  { %v320_v32 = vmax.f32 %v314_v26, 0.0  ;;  %v1862_v14 = vpack.c.bf16 %v579_v13, %v578_v12 }
 0x163   :  { %v319_v33 = vmax.f32 %v309_v30, 0.0  ;;  %v339_v34 = vsel %vm158_vm0, %v333_v29, %v334_v25  ;;  %v327_v35 = vsel %vm145_vm5, %v321_v28, %v322_v21 }
 0x164   :  { %v324_v36 = vrot.slane %v320_v32, 7  ;;  %v336_v37 = vrot.slane %v320_v32, 1  ;;  %355 = vrot.lane.b32.xlu1 %v320_v32, %s1988_s23  ;;  %1863 = vmatprep.subr.bf16.mxu0 %v1862_v14 }
 0x165   :  { %v323_v38 = vrot.slane %v319_v33, 7  ;;  %v335_v39 = vrot.slane %v319_v33, 1  ;;  %365 = vrot.lane.b32.xlu0 %v339_v34, %s1989_s3  ;;  %1865 = vmatpush3.bf16.msra.mxu0 %v1862_v14  ;;  %v690_v14 = vld [vmem:[%s2722_s8 + $0x10] sm:$0xff] }
 0x166   :  { %v340_v40 = vsel %vm158_vm0, %v336_v37, %v333_v29  ;;  %v328_v41 = vsel %vm145_vm5, %v324_v36, %v321_v28  ;;  %1867 = vmatprep.subr.bf16.mxu0 %v1866_v17  ;;  %v1878_v16 = vpack.c.bf16 %v691_v15, %v690_v14 }
 0x167   :  { %v338_v42 = vsel %vm158_vm0, %v334_v25, %v335_v39  ;;  %v337_v43 = vsel %vm158_vm0, %v335_v39, %v336_v37  ;;  %v325_v45 = vsel %vm145_vm5, %v323_v38, %v324_v36  ;;  %v326_v46 = vsel %vm145_vm5, %v322_v21, %v323_v38 }
 0x168   :  { %v342_v44 = vmul.f32 %v2136_v23, %v338_v42  ;;  %v344_v47 = vmul.f32 %v2138_v24, %v340_v40  ;;  %v329_v50 = vmul.f32 %v2132_v22, %v328_v41  ;;  %v331_v58 = vmul.f32 %v2149_v31, %v326_v46  ;;  %v688_v41 = vld [vmem:[%s2722_s8] sm:$0xff]  ;;  %v689_v42 = vld [vmem:[%s2722_s8 + $0x8] sm:$0xff] }
 0x169   :  { %353 = vrot.lane.b32.xlu0 %v319_v33, %s1988_s23  ;;  %1869 = vmatpush3.bf16.msra.mxu0 %v1866_v17  ;;  %v1870_v21 = vpack.c.bf16 %v583_v19, %v582_v18  ;;  %v1874_v46 = vpack.c.bf16 %v689_v42, %v688_v41  ;;  %v1540_v17 = vld [vmem:[%s2721_s7] ss:$0 sm:$0xff]  ;;  %s1990_s7 = smov 112  }
 0x16a   :  { %367 = vrot.lane.b32.xlu1 %v342_v44, %s1989_s3 }
 0x16b   :  { %1871 = vmatprep.subr.bf16.mxu0 %v1870_v21  ;;  %1875 = vmatprep.subr.bf16.mxu1 %v1874_v46 }
 0x16d   :  { %369 = vrot.lane.b32.xlu0 %v337_v43, %s1989_s3  ;;  %1873 = vmatpush3.bf16.msra.mxu0 %v1870_v21 }
 0x16e   :  { %371 = vrot.lane.b32.xlu1 %v344_v47, %s1989_s3 }
 0x1d2   :  { %v352_v48 = vpop.permute.xlu1 %351 }
 0x1d3   :  { %v350_v49 = vpop.permute.xlu0 %349  ;;  %v379_v56 = vsel %vm377_vm9, %v327_v35, %v352_v48 }
 0x1d4   :  { %v378_v51 = vsel %vm377_vm9, %v329_v50, %v350_v49 }
 0x1d6   :  { %v356_v53 = vpop.permute.xlu1 %355 }
 0x1d7   :  { %v366_v52 = vpop.permute.xlu0 %365  ;;  %v381_v62 = vsel %vm377_vm9, %v325_v45, %v356_v53 }
 0x1d8   :  { %v383_v54 = vsel %vm382_vm10, %v378_v51, %v366_v52 }
 0x1d9   :  { %1694 = vmatprep.mubr.msk.f32.mxu1 %vm406_vm11, %v383_v54 }
 0x1db   :  { %v354_v55 = vpop.permute.xlu0 %353 }
 0x1dc   :  { %v368_v57 = vpop.permute.xlu1 %367  ;;  %v380_v60 = vsel %vm377_vm9, %v331_v58, %v354_v55 }
 0x1dd   :  { %v384_v59 = vsel %vm382_vm10, %v379_v56, %v368_v57 }
 0x1de   :  { %1695 = vmatmul.mubr.msk.f32.vlgmr.msra.gmra.mrb[4].mxu1 %vm406_vm11, %v384_v59 }
 0x1df   :  { %v370_v61 = vpop.permute.xlu0 %369  ;;  %1877 = vmatpush3.bf16.msra.mxu1 %v1874_v46 }
 0x1e0   :  { %v385_v63 = vsel %vm382_vm10, %v380_v60, %v370_v61  ;;  %v372_v0 = vpop.permute.xlu1 %371  ;;  %1879 = vmatprep.subr.bf16.mxu1 %v1878_v16 }
 0x1e1   :  { %v386_v1 = vsel %vm382_vm10, %v381_v62, %v372_v0  ;;  %1697 = vmatprep.mubr.msk.f32.mxu1 %vm406_vm11, %v385_v63 }
 0x1e2   :  { %1698 = vmatmul.mubr.msk.f32.gmra.mrb[6].mxu1 %vm406_vm11, %v386_v1 }
 0x1e3   :  { %1881 = vmatpush3.bf16.msra.mxu1 %v1878_v16  ;;  %v137_v16 = vld [vmem:[%s2737_s4] sm:$0xff] }
 0x2b1   :  { %v1696_v25 = vpop.f32.mrb[4].mxu1 }
 0x2b2   :  { %v491_v26 = vadd.f32 %v1696_v25, %v1535_v20  ;;  %v485_v27 = vpop.f32.mrb[5].mxu1 }
 0x2b3   :  { %v486_v28 = vadd.f32 %v1535_v20, %v485_v27 }
 0x2b4   :  { %v505_v29 = vmax.f32 %v491_v26, 0.0 }
 0x2b5   :  { %v504_v30 = vmax.f32 %v486_v28, 0.0  ;;  %v1699_v32 = vpop.f32.mrb[6].mxu1 }
 0x2b6   :  { %v509_v33 = vrot.slane %v505_v29, 7  ;;  %v521_v34 = vrot.slane %v505_v29, 1  ;;  %v501_v35 = vadd.f32 %v1699_v32, %v1535_v20  ;;  %538 = vrot.lane.b32.xlu1 %v505_v29, %s1988_s23  ;;  %v495_v36 = vpop.f32.mrb[7].mxu1  ;;  %v1545_v29 = vld [vmem:[%s2723_s9] ss:$0 sm:$0xff] }
 0x2b7   :  { %v508_v37 = vrot.slane %v504_v30, 7  ;;  %v520_v38 = vrot.slane %v504_v30, 1  ;;  %v496_v39 = vadd.f32 %v1535_v20, %v495_v36  ;;  %536 = vrot.lane.b32.xlu0 %v504_v30, %s1988_s23 }
 0x2b8   :  { %v507_v40 = vmax.f32 %v501_v35, 0.0 }
 0x2b9   :  { %v506_v43 = vmax.f32 %v496_v39, 0.0  ;;  %v526_v44 = vsel %vm158_vm0, %v520_v38, %v521_v34  ;;  %v514_v45 = vsel %vm145_vm5, %v508_v37, %v509_v33 }
 0x2ba   :  { %v511_v47 = vrot.slane %v507_v40, 7  ;;  %v523_v48 = vrot.slane %v507_v40, 1  ;;  %542 = vrot.lane.b32.xlu1 %v507_v40, %s1988_s23 }
 0x2bb   :  { %v510_v49 = vrot.slane %v506_v43, 7  ;;  %v522_v50 = vrot.slane %v506_v43, 1  ;;  %552 = vrot.lane.b32.xlu0 %v526_v44, %s1989_s3 }
 0x2bc   :  { %v527_v51 = vsel %vm158_vm0, %v523_v48, %v520_v38  ;;  %v515_v52 = vsel %vm145_vm5, %v511_v47, %v508_v37 }
 0x2bd   :  { %v525_v53 = vsel %vm158_vm0, %v521_v34, %v522_v50  ;;  %v524_v54 = vsel %vm158_vm0, %v522_v50, %v523_v48  ;;  %v512_v56 = vsel %vm145_vm5, %v510_v49, %v511_v47  ;;  %v513_v57 = vsel %vm145_vm5, %v509_v33, %v510_v49 }
 0x2be   :  { %v529_v55 = vmul.f32 %v2136_v23, %v525_v53  ;;  %v531_v58 = vmul.f32 %v2138_v24, %v527_v51  ;;  %v516_v61 = vmul.f32 %v2132_v22, %v515_v52  ;;  %v518_v5 = vmul.f32 %v2149_v31, %v513_v57 }
 0x2bf   :  { %540 = vrot.lane.b32.xlu0 %v506_v43, %s1988_s23 }
 0x2c0   :  { %554 = vrot.lane.b32.xlu1 %v529_v55, %s1989_s3 }
 0x2c3   :  { %556 = vrot.lane.b32.xlu0 %v524_v54, %s1989_s3 }
 0x2c4   :  { %558 = vrot.lane.b32.xlu1 %v531_v58, %s1989_s3 }
 0x328   :  { %v539_v59 = vpop.permute.xlu1 %538 }
 0x329   :  { %v537_v60 = vpop.permute.xlu0 %536  ;;  %v565_v3 = vsel %vm377_vm9, %v514_v45, %v539_v59 }
 0x32a   :  { %v564_v62 = vsel %vm377_vm9, %v516_v61, %v537_v60 }
 0x32c   :  { %v543_v0 = vpop.permute.xlu1 %542 }
 0x32d   :  { %v553_v63 = vpop.permute.xlu0 %552  ;;  %v567_v10 = vsel %vm377_vm9, %v512_v56, %v543_v0 }
 0x32e   :  { %v568_v1 = vsel %vm382_vm10, %v564_v62, %v553_v63 }
 0x32f   :  { %1724 = vmatprep.mubr.msk.f32.mxu0 %vm406_vm11, %v568_v1 }
 0x331   :  { %v541_v2 = vpop.permute.xlu0 %540 }
 0x332   :  { %v555_v4 = vpop.permute.xlu1 %554  ;;  %v566_v8 = vsel %vm377_vm9, %v518_v5, %v541_v2 }
 0x333   :  { %v569_v6 = vsel %vm382_vm10, %v565_v3, %v555_v4  ;;  %v920_v3 = vld [vmem:[%s2724_s10] sm:$0xff]  ;;  %v921_v4 = vld [vmem:[%s2724_s10 + $0x8] sm:$0xff] }
 0x334   :  { %1725 = vmatmul.mubr.msk.f32.vlgmr.msra.gmra.mrb[0].mxu0 %vm406_vm11, %v569_v6  ;;  %v1882_v5 = vpack.c.bf16 %v921_v4, %v920_v3  ;;  %v922_v6 = vld [vmem:[%s2724_s10 + $0x10] sm:$0xff] }
 0x335   :  { %v557_v9 = vpop.permute.xlu0 %556 }
 0x336   :  { %v570_v11 = vsel %vm382_vm10, %v566_v8, %v557_v9  ;;  %v559_v12 = vpop.permute.xlu1 %558  ;;  %1883 = vmatprep.subr.bf16.mxu0 %v1882_v5  ;;  %v923_v8 = vld [vmem:[%s2724_s10 + $0x18] sm:$0xff] }
 0x337   :  { %v571_v13 = vsel %vm382_vm10, %v567_v10, %v559_v12  ;;  %1727 = vmatprep.mubr.msk.f32.mxu0 %vm406_vm11, %v570_v11  ;;  %1885 = vmatpush3.bf16.msra.mxu0 %v1882_v5  ;;  %v1886_v9 = vpack.c.bf16 %v923_v8, %v922_v6  ;;  %v138_v10 = vld [vmem:[%s2737_s4 + $0x8] sm:$0xff]  ;;  %v924_v12 = vld [vmem:[%s2724_s10 + $0x20] sm:$0xff] }
 0x338   :  { %1728 = vmatmul.mubr.msk.f32.gmra.mrb[2].mxu0 %vm406_vm11, %v571_v13  ;;  %v925_v13 = vld [vmem:[%s2724_s10 + $0x28] sm:$0xff] }
 0x339   :  { %1887 = vmatprep.subr.bf16.mxu0 %v1886_v9  ;;  %v1890_v15 = vpack.c.bf16 %v925_v13, %v924_v12 }
 0x33b   :  { %1889 = vmatpush3.bf16.msra.mxu0 %v1886_v9 }
 0x33c   :  { %1891 = vmatprep.subr.bf16.mxu0 %v1890_v15 }
 0x33f   :  { %1893 = vmatpush3.bf16.msra.mxu0 %v1890_v15  ;;  %v1100_v15 = vld [vmem:[%s2726_s12 + $0x8] sm:$0xff] }
 0x407   :  { %v1726_v18 = vpop.f32.mrb[0].mxu0 }
 0x408   :  { %v669_v19 = vpop.f32.mrb[1].mxu0  ;;  %v675_v21 = vadd.f32 %v1726_v18, %v1540_v17  ;;  %v139_v18 = vld [vmem:[%s2737_s4 + $0x10] sm:$0xff] }
 0x409   :  { %v670_v20 = vadd.f32 %v1540_v17, %v669_v19 }
 0x40b   :  { %v1729_v25 = vpop.f32.mrb[2].mxu0  ;;  %1738 = vmatprep.mubr.msk.f32.mxu1 %vm377_vm9, %v670_v20 }
 0x40c   :  { %v679_v26 = vpop.f32.mrb[3].mxu0  ;;  %1739 = vmatmul.mubr.msk.f32.vlgmr.msra.gmra.mrb[8].mxu1 %vm377_vm9, %v675_v21  ;;  %v685_v28 = vadd.f32 %v1729_v25, %v1540_v17 }
 0x40d   :  { %v680_v27 = vadd.f32 %v1540_v17, %v679_v26 }
 0x40f   :  { %1741 = vmatprep.mubr.msk.f32.mxu1 %vm377_vm9, %v680_v27  ;;  %v140_v27 = vld [vmem:[%s2737_s4 + $0x18] sm:$0xff] }
 0x410   :  { %1742 = vmatmul.mubr.msk.f32.gmra.mrb[10].mxu1 %vm377_vm9, %v685_v28 }
 0x4df   :  { %v1740_v30 = vpop.f32.mrb[8].mxu1 }
 0x4e0   :  { %v2359_v32 = vadd.f32 %v1740_v30, %v1545_v29  ;;  %v777_v33 = vpop.f32.mrb[9].mxu1 }
 0x4e1   :  { %v2361_v34 = vadd.f32 %v1545_v29, %v777_v33 }
 0x4e2   :  { %v798_v35 = vmul.f32 1.442695, %v2359_v32 }
 0x4e3   :  { %v796_v36 = vmul.f32 1.442695, %v2361_v34  ;;  %v1743_v37 = vpop.f32.mrb[10].mxu1 }
 0x4e4   :  { %1953 = vpow2.f32 %v798_v35  ;;  %v2365_v38 = vadd.f32 %v1743_v37, %v1545_v29  ;;  %v787_v39 = vpop.f32.mrb[11].mxu1 }
 0x4e5   :  { %1955 = vpow2.f32 %v796_v36  ;;  %v2367_v40 = vadd.f32 %v1545_v29, %v787_v39 }
 0x4e6   :  { %v802_v41 = vmul.f32 1.442695, %v2365_v38 }
 0x4e7   :  { %v800_v42 = vmul.f32 1.442695, %v2367_v40  ;;  %v1432_v7 = vmul.f32 %v2367_v40, %v2367_v40 }
 0x4e8   :  { %1957 = vpow2.f32 %v802_v41 }
 0x4e9   :  { %1959 = vpow2.f32 %v800_v42 }
 0x4ee   :  { %v2371_v43 = vpop.eup %1953 }
 0x4ef   :  { %v2373_v44 = vpop.eup %1955  ;;  %1961 = vrsqrt.f32 %v2371_v43  ;;  %vm813_vm12 = vcmp.eq.f32.partialorder %v2371_v43, inf  ;;  %v816_v50 = vand.u32 2147483648, %v2371_v43  ;;  %vm815_vm13 = vcmp.eq.f32.partialorder %v2371_v43, 0.0 }
 0x4f0   :  { %1963 = vrsqrt.f32 %v2373_v44  ;;  %vm806_vm14 = vcmp.eq.f32.partialorder %v2373_v44, inf  ;;  %v809_v57 = vand.u32 2147483648, %v2373_v44  ;;  %vm808_vm15 = vcmp.eq.f32.partialorder %v2373_v44, 0.0 }
 0x4f2   :  { %v2377_v45 = vpop.eup %1957 }
 0x4f3   :  { %v2379_v46 = vpop.eup %1959  ;;  %1965 = vrsqrt.f32 %v2377_v45  ;;  %vm827_vm3 = vcmp.eq.f32.partialorder %v2377_v45, inf  ;;  %v830_v1 = vand.u32 2147483648, %v2377_v45  ;;  %vm829_vm4 = vcmp.eq.f32.partialorder %v2377_v45, 0.0 }
 0x4f4   :  { %1967 = vrsqrt.f32 %v2379_v46  ;;  %vm820_vm1 = vcmp.eq.f32.partialorder %v2379_v46, inf  ;;  %v823_v60 = vand.u32 2147483648, %v2379_v46  ;;  %vm822_vm2 = vcmp.eq.f32.partialorder %v2379_v46, 0.0 }
 0x4f9   :  { %v1962_v47 = vpop.eup %1961 }
 0x4fa   :  { %v1964_v48 = vpop.eup %1963  ;;  %v812_v49 = vmul.f32 %v1962_v47, %v2371_v43 }
 0x4fb   :  { %v805_v51 = vmul.f32 %v1964_v48, %v2373_v44 }
 0x4fc   :  { %v814_v52 = vsel %vm813_vm12, %v2371_v43, %v812_v49 }
 0x4fd   :  { %v1966_v53 = vpop.eup %1965  ;;  %v817_v54 = vsel %vm815_vm13, %v816_v50, %v814_v52  ;;  %v807_v56 = vsel %vm806_vm14, %v2373_v44, %v805_v51 }
 0x4fe   :  { %v1968_v55 = vpop.eup %1967  ;;  %838 = vrot.lane.b32.xlu0 %v817_v54, %s1990_s7  ;;  %v826_v59 = vmul.f32 %v1966_v53, %v2377_v45  ;;  %v810_v61 = vsel %vm808_vm15, %v809_v57, %v807_v56 }
 0x4ff   :  { %v819_v58 = vmul.f32 %v1968_v55, %v2379_v46 }
 0x500   :  { %v828_v0 = vsel %vm827_vm3, %v2377_v45, %v826_v59 }
 0x501   :  { %v821_v62 = vsel %vm820_vm1, %v2379_v46, %v819_v58  ;;  %v831_v2 = vsel %vm829_vm4, %v830_v1, %v828_v0 }
 0x502   :  { %836 = vrot.lane.b32.xlu0 %v810_v61, %s1990_s7  ;;  %v824_v63 = vsel %vm822_vm2, %v823_v60, %v821_v62 }
 0x503   :  { %840 = vrot.lane.b32.xlu1 %v824_v63, %s1990_s7 }
 0x507   :  { %842 = vrot.lane.b32.xlu1 %v831_v2, %s1990_s7 }
 0x570   :  { %v839_v11 = vpop.permute.xlu0 %838 }
 0x571   :  { %v849_v14 = vmul.f32 %v839_v11, %v138_v10 }
 0x573   :  { %v853_v17 = vadd.f32 %v849_v14, %v2359_v32  ;;  %v1099_v14 = vld [vmem:[%s2726_s12] sm:$0xff] }
 0x574   :  { %v837_v19 = vpop.permute.xlu0 %836 }
 0x575   :  { %v848_v20 = vmul.f32 %v837_v19, %v137_v16  ;;  %886 = vrot.lane.b32.xlu1 %v853_v17, %s1986_s25  ;;  %v841_v21 = vpop.permute.xlu1 %840  ;;  %v857_v29 = vrot.slane %v853_v17, 7  ;;  %v869_v36 = vrot.slane %v853_v17, 1  ;;  %v1101_v16 = vld [vmem:[%s2726_s12 + $0x10] sm:$0xff]  ;;  %v1894_v17 = vpack.c.bf16 %v1100_v15, %v1099_v14 }
 0x576   :  { %v850_v25 = vmul.f32 %v841_v21, %v139_v18  ;;  %v1102_v18 = vld [vmem:[%s2726_s12 + $0x18] sm:$0xff]  ;;  %v1104_v21 = vld [vmem:[%s2726_s12 + $0x28] sm:$0xff] }
 0x577   :  { %v852_v26 = vadd.f32 %v848_v20, %v2361_v34  ;;  %v1898_v19 = vpack.c.bf16 %v1102_v18, %v1101_v16  ;;  %v1103_v20 = vld [vmem:[%s2726_s12 + $0x20] sm:$0xff]  ;;  %1895 = vmatprep.subr.bf16.mxu1 %v1894_v17 }
 0x578   :  { %v854_v28 = vadd.f32 %v850_v25, %v2367_v40  ;;  %1897 = vmatpush3.bf16.msra.mxu1 %v1894_v17  ;;  %v1902_v25 = vpack.c.bf16 %v1104_v21, %v1103_v20 }
 0x579   :  { %v856_v30 = vrot.slane %v852_v26, 7  ;;  %884 = vrot.lane.b32.xlu0 %v852_v26, %s1986_s25  ;;  %v843_v33 = vpop.permute.xlu1 %842  ;;  %v868_v35 = vrot.slane %v852_v26, 1  ;;  %1899 = vmatprep.subr.bf16.mxu1 %v1898_v19  ;;  %v1105_v26 = vld [vmem:[%s2726_s12 + $0x30] sm:$0xff] }
 0x57a   :  { %v858_v37 = vrot.slane %v854_v28, 7  ;;  %v870_v39 = vrot.slane %v854_v28, 1  ;;  %v851_v41 = vmul.f32 %v843_v33, %v140_v27  ;;  %v1106_v27 = vld [vmem:[%s2726_s12 + $0x38] sm:$0xff] }
 0x57b   :  { %v874_v42 = vsel %vm158_vm0, %v868_v35, %v869_v36  ;;  %v862_v47 = vsel %vm145_vm5, %v856_v30, %v857_v29 }
 0x57c   :  { %v855_v48 = vadd.f32 %v851_v41, %v2365_v38  ;;  %v861_v49 = vsel %vm145_vm5, %v857_v29, %v858_v37  ;;  %v873_v50 = vsel %vm158_vm0, %v869_v36, %v870_v39  ;;  %1901 = vmatpush3.bf16.msra.mxu1 %v1898_v19  ;;  %v1107_v29 = vld [vmem:[%s2726_s12 + $0x40] sm:$0xff]  ;;  %v1110_v36 = vld [vmem:[%s2726_s12 + $0x58] sm:$0xff] }
 0x57d   :  { %900 = vrot.lane.b32.xlu0 %v874_v42, %s1988_s23  ;;  %v877_v53 = vmul.f32 %v2136_v23, %v873_v50  ;;  %v866_v5 = vmul.f32 %v2149_v31, %v861_v49  ;;  %1903 = vmatprep.subr.bf16.mxu1 %v1902_v25 }
 0x57e   :  { %v859_v51 = vrot.slane %v855_v48, 7  ;;  %890 = vrot.lane.b32.xlu1 %v855_v48, %s1986_s25  ;;  %v871_v52 = vrot.slane %v855_v48, 1 }
 0x580   :  { %v863_v54 = vsel %vm145_vm5, %v859_v51, %v856_v30  ;;  %v860_v55 = vsel %vm145_vm5, %v858_v37, %v859_v51  ;;  %v875_v56 = vsel %vm158_vm0, %v871_v52, %v868_v35  ;;  %v872_v57 = vsel %vm158_vm0, %v870_v39, %v871_v52  ;;  %1905 = vmatpush3.bf16.msra.mxu1 %v1902_v25  ;;  %v1108_v30 = vld [vmem:[%s2726_s12 + $0x48] sm:$0xff]  ;;  %v1109_v35 = vld [vmem:[%s2726_s12 + $0x50] sm:$0xff]  ;;  %v1550_v37 = vld [vmem:[%s2725_s11] ss:$0 sm:$0xff]  ;;  %s1973_s12 = scalar_lea.hbm %s2731_s17, 16 }
 0x581   :  { %888 = vrot.lane.b32.xlu0 %v854_v28, %s1986_s25  ;;  %v879_v58 = vmul.f32 %v2138_v24, %v875_v56  ;;  %v864_v61 = vmul.f32 %v2132_v22, %v863_v54  ;;  %v1906_v28 = vpack.c.bf16 %v1106_v27, %v1105_v26  ;;  %v1910_v33 = vpack.c.bf16 %v1108_v30, %v1107_v29  ;;  %p1974_p0 = scmp.ne.s32.totalorder %s2731_s17, %s1973_s12  ;;  %p1977_p1 = scmp.lt.u32.totalorder %s1973_s12, %s2731_s17 }
 0x582   :  { %902 = vrot.lane.b32.xlu1 %v877_v53, %s1988_s23  ;;  %v1914_v39 = vpack.c.bf16 %v1110_v36, %v1109_v35  ;;  %v1283_v36 = vld [vmem:[%s2728_s14] sm:$0xff] }
 0x583   :  { %1907 = vmatprep.subr.bf16.mxu1 %v1906_v28  ;;  %p1979_p2 = pnand %p1977_p1, %p1974_p0 }
 0x584   :  { %1909 = vmatpush3.bf16.msra.mxu1 %v1906_v28 }
 0x585   :  { %904 = vrot.lane.b32.xlu0 %v872_v57, %s1988_s23  ;;  %1911 = vmatprep.subr.bf16.mxu1 %v1910_v33 }
 0x586   :  { %906 = vrot.lane.b32.xlu1 %v879_v58, %s1988_s23 }
 0x588   :  { %1913 = vmatpush3.bf16.msra.mxu1 %v1910_v33 }
 0x589   :  { %1915 = vmatprep.subr.bf16.mxu1 %v1914_v39 }
 0x58c   :  { %1917 = vmatpush3.bf16.msra.mxu1 %v1914_v39  ;;  %v1285_v39 = vld [vmem:[%s2728_s14 + $0x10] sm:$0xff] }
 0x5e7   :  { %v887_v60 = vpop.permute.xlu1 %886 }
 0x5e8   :  { %v913_v3 = vsel %vm204_vm7, %v862_v47, %v887_v60 }
 0x5eb   :  { %v885_v59 = vpop.permute.xlu0 %884 }
 0x5ec   :  { %v912_v62 = vsel %vm204_vm7, %v864_v61, %v885_v59 }
 0x5ef   :  { %v901_v63 = vpop.permute.xlu0 %900 }
 0x5f0   :  { %v916_v0 = vsel %vm377_vm9, %v912_v62, %v901_v63  ;;  %v891_v1 = vpop.permute.xlu1 %890 }
 0x5f1   :  { %1756 = vmatprep.mubr.msk.f32.mxu0 %vm933_vm8, %v916_v0  ;;  %v915_v10 = vsel %vm204_vm7, %v860_v55, %v891_v1 }
 0x5f3   :  { %v889_v2 = vpop.permute.xlu0 %888 }
 0x5f4   :  { %v903_v4 = vpop.permute.xlu1 %902  ;;  %v914_v8 = vsel %vm204_vm7, %v866_v5, %v889_v2 }
 0x5f5   :  { %v917_v6 = vsel %vm377_vm9, %v913_v3, %v903_v4 }
 0x5f6   :  { %1757 = vmatmul.mubr.msk.f32.vlgmr.msra.gmra.mrb[4].mxu0 %vm933_vm8, %v917_v6 }
 0x5f7   :  { %v905_v9 = vpop.permute.xlu0 %904 }
 0x5f8   :  { %v918_v11 = vsel %vm377_vm9, %v914_v8, %v905_v9  ;;  %v907_v12 = vpop.permute.xlu1 %906 }
 0x5f9   :  { %v919_v13 = vsel %vm377_vm9, %v915_v10, %v907_v12  ;;  %1759 = vmatprep.mubr.msk.f32.mxu0 %vm933_vm8, %v918_v11 }
 0x5fa   :  { %1760 = vmatmul.mubr.msk.f32.gmra.mrb[6].mxu0 %vm933_vm8, %v919_v13 }
 0x6c9   :  { %v1758_v41 = vpop.f32.mrb[4].mxu0 }
 0x6ca   :  { %v1018_v42 = vadd.f32 %v1758_v41, %v1550_v37  ;;  %v1012_v47 = vpop.f32.mrb[5].mxu0 }
 0x6cb   :  { %v1013_v48 = vadd.f32 %v1550_v37, %v1012_v47 }
 0x6cc   :  { %v1032_v49 = vmax.f32 %v1018_v42, 0.0  ;;  %v1286_v42 = vld [vmem:[%s2728_s14 + $0x18] sm:$0xff] }
 0x6cd   :  { %v1031_v50 = vmax.f32 %v1013_v48, 0.0  ;;  %v1761_v51 = vpop.f32.mrb[6].mxu0  ;;  %v1922_v47 = vpack.c.bf16 %v1286_v42, %v1285_v39  ;;  %v1287_v48 = vld [vmem:[%s2728_s14 + $0x20] sm:$0xff] }
 0x6ce   :  { %v1036_v52 = vrot.slane %v1032_v49, 7  ;;  %v1048_v53 = vrot.slane %v1032_v49, 1  ;;  %v1028_v54 = vadd.f32 %v1761_v51, %v1550_v37  ;;  %1065 = vrot.lane.b32.xlu1 %v1032_v49, %s1988_s23  ;;  %v1022_v55 = vpop.f32.mrb[7].mxu0  ;;  %v1288_v49 = vld [vmem:[%s2728_s14 + $0x28] sm:$0xff]  ;;  %v1289_v51 = vld [vmem:[%s2728_s14 + $0x30] sm:$0xff] }
 0x6cf   :  { %v1035_v56 = vrot.slane %v1031_v50, 7  ;;  %v1047_v57 = vrot.slane %v1031_v50, 1  ;;  %v1023_v58 = vadd.f32 %v1550_v37, %v1022_v55  ;;  %1063 = vrot.lane.b32.xlu0 %v1031_v50, %s1988_s23  ;;  %v1284_v37 = vld [vmem:[%s2728_s14 + $0x8] sm:$0xff]  ;;  %v1926_v50 = vpack.c.bf16 %v1288_v49, %v1287_v48 }
 0x6d0   :  { %v1034_v59 = vmax.f32 %v1028_v54, 0.0  ;;  %v1918_v41 = vpack.c.bf16 %v1284_v37, %v1283_v36  ;;  %v1291_v54 = vld [vmem:[%s2728_s14 + $0x40] sm:$0xff]  ;;  %v1292_v55 = vld [vmem:[%s2728_s14 + $0x48] sm:$0xff] }
 0x6d1   :  { %v1033_v60 = vmax.f32 %v1023_v58, 0.0  ;;  %v1053_v61 = vsel %vm158_vm0, %v1047_v57, %v1048_v53  ;;  %v1041_v62 = vsel %vm145_vm5, %v1035_v56, %v1036_v52  ;;  %v1294_v58 = vld [vmem:[%s2728_s14 + $0x58] sm:$0xff] }
 0x6d2   :  { %v1038_v63 = vrot.slane %v1034_v59, 7  ;;  %v1050_v0 = vrot.slane %v1034_v59, 1  ;;  %1069 = vrot.lane.b32.xlu1 %v1034_v59, %s1988_s23  ;;  %1919 = vmatprep.subr.bf16.mxu0 %v1918_v41  ;;  %v1555_v59 = vld [vmem:[%s2727_s13] ss:$0 sm:$0xff] }
 0x6d3   :  { %v1037_v1 = vrot.slane %v1033_v60, 7  ;;  %v1049_v2 = vrot.slane %v1033_v60, 1  ;;  %1079 = vrot.lane.b32.xlu0 %v1053_v61, %s1989_s3  ;;  %1921 = vmatpush3.bf16.msra.mxu0 %v1918_v41 }
 0x6d4   :  { %v1054_v3 = vsel %vm158_vm0, %v1050_v0, %v1047_v57  ;;  %v1042_v4 = vsel %vm145_vm5, %v1038_v63, %v1035_v56  ;;  %1923 = vmatprep.subr.bf16.mxu0 %v1922_v47  ;;  %v1934_v56 = vpack.c.bf16 %v1292_v55, %v1291_v54  ;;  %v1293_v57 = vld [vmem:[%s2728_s14 + $0x50] sm:$0xff] }
 0x6d5   :  { %v1052_v5 = vsel %vm158_vm0, %v1048_v53, %v1049_v2  ;;  %v1051_v6 = vsel %vm158_vm0, %v1049_v2, %v1050_v0  ;;  %v1039_v9 = vsel %vm145_vm5, %v1037_v1, %v1038_v63  ;;  %v1040_v10 = vsel %vm145_vm5, %v1036_v52, %v1037_v1  ;;  %v1290_v52 = vld [vmem:[%s2728_s14 + $0x38] sm:$0xff] }
 0x6d6   :  { %v1056_v8 = vmul.f32 %v2136_v23, %v1052_v5  ;;  %v1058_v11 = vmul.f32 %v2138_v24, %v1054_v3  ;;  %v1043_v14 = vmul.f32 %v2132_v22, %v1042_v4  ;;  %v1045_v25 = vmul.f32 %v2149_v31, %v1040_v10 }
 0x6d7   :  { %1067 = vrot.lane.b32.xlu0 %v1033_v60, %s1988_s23  ;;  %1925 = vmatpush3.bf16.msra.mxu0 %v1922_v47  ;;  %v1930_v53 = vpack.c.bf16 %v1290_v52, %v1289_v51  ;;  %v1938_v60 = vpack.c.bf16 %v1294_v58, %v1293_v57 }
 0x6d8   :  { %1081 = vrot.lane.b32.xlu1 %v1056_v8, %s1989_s3  ;;  %1927 = vmatprep.subr.bf16.mxu0 %v1926_v50 }
 0x6db   :  { %1083 = vrot.lane.b32.xlu0 %v1051_v6, %s1989_s3  ;;  %1929 = vmatpush3.bf16.msra.mxu0 %v1926_v50 }
 0x6dc   :  { %1085 = vrot.lane.b32.xlu1 %v1058_v11, %s1989_s3  ;;  %1931 = vmatprep.subr.bf16.mxu0 %v1930_v53 }
 0x6df   :  { %1933 = vmatpush3.bf16.msra.mxu0 %v1930_v53 }
 0x6e0   :  { %1935 = vmatprep.subr.bf16.mxu0 %v1934_v56 }
 0x6e3   :  { %1937 = vmatpush3.bf16.msra.mxu0 %v1934_v56 }
 0x6e4   :  { %1939 = vmatprep.subr.bf16.mxu0 %v1938_v60 }
 0x6e7   :  { %1941 = vmatpush3.bf16.msra.mxu0 %v1938_v60 }
 0x740   :  { %v1066_v12 = vpop.permute.xlu1 %1065 }
 0x741   :  { %v1064_v13 = vpop.permute.xlu0 %1063  ;;  %v1092_v20 = vsel %vm377_vm9, %v1041_v62, %v1066_v12 }
 0x742   :  { %v1091_v15 = vsel %vm377_vm9, %v1043_v14, %v1064_v13 }
 0x744   :  { %v1070_v17 = vpop.permute.xlu1 %1069 }
 0x745   :  { %v1080_v16 = vpop.permute.xlu0 %1079  ;;  %v1094_v29 = vsel %vm377_vm9, %v1039_v9, %v1070_v17 }
 0x746   :  { %v1095_v18 = vsel %vm382_vm10, %v1091_v15, %v1080_v16 }
 0x747   :  { %1786 = vmatprep.mubr.msk.f32.mxu1 %vm406_vm11, %v1095_v18 }
 0x749   :  { %v1068_v19 = vpop.permute.xlu0 %1067 }
 0x74a   :  { %v1082_v21 = vpop.permute.xlu1 %1081  ;;  %v1093_v27 = vsel %vm377_vm9, %v1045_v25, %v1068_v19 }
 0x74b   :  { %v1096_v26 = vsel %vm382_vm10, %v1092_v20, %v1082_v21 }
 0x74c   :  { %1787 = vmatmul.mubr.msk.f32.vlgmr.msra.gmra.mrb[12].mxu1 %vm406_vm11, %v1096_v26 }
 0x74d   :  { %v1084_v28 = vpop.permute.xlu0 %1083 }
 0x74e   :  { %v1097_v30 = vsel %vm382_vm10, %v1093_v27, %v1084_v28  ;;  %v1086_v33 = vpop.permute.xlu1 %1085 }
 0x74f   :  { %v1098_v35 = vsel %vm382_vm10, %v1094_v29, %v1086_v33  ;;  %1789 = vmatprep.mubr.msk.f32.mxu1 %vm406_vm11, %v1097_v30  ;;  %v1430_v33 = vmul.f32 %v2361_v34, %v2361_v34 }
 0x750   :  { %1790 = vmatmul.mubr.msk.f32.gmra.mrb[14].mxu1 %vm406_vm11, %v1098_v35 }
 0x81f   :  { %v1788_v61 = vpop.f32.mrb[12].mxu1 }
 0x820   :  { %v1202_v62 = vadd.f32 %v1788_v61, %v1555_v59  ;;  %v1196_v63 = vpop.f32.mrb[13].mxu1 }
 0x821   :  { %v1197_v0 = vadd.f32 %v1555_v59, %v1196_v63 }
 0x822   :  { %v1216_v1 = vmax.f32 %v1202_v62, 0.0 }
 0x823   :  { %v1215_v2 = vmax.f32 %v1197_v0, 0.0  ;;  %v1791_v3 = vpop.f32.mrb[14].mxu1 }
 0x824   :  { %v1220_v4 = vrot.slane %v1216_v1, 7  ;;  %v1232_v5 = vrot.slane %v1216_v1, 1  ;;  %v1212_v6 = vadd.f32 %v1791_v3, %v1555_v59  ;;  %1249 = vrot.lane.b32.xlu1 %v1216_v1, %s1988_s23  ;;  %v1206_v8 = vpop.f32.mrb[15].mxu1 }
 0x825   :  { %v1219_v9 = vrot.slane %v1215_v2, 7  ;;  %v1231_v10 = vrot.slane %v1215_v2, 1  ;;  %v1207_v11 = vadd.f32 %v1555_v59, %v1206_v8  ;;  %1247 = vrot.lane.b32.xlu0 %v1215_v2, %s1988_s23 }
 0x826   :  { %v1218_v12 = vmax.f32 %v1212_v6, 0.0 }
 0x827   :  { %v1217_v13 = vmax.f32 %v1207_v11, 0.0  ;;  %v1237_v14 = vsel %vm158_vm0, %v1231_v10, %v1232_v5  ;;  %v1225_v15 = vsel %vm145_vm5, %v1219_v9, %v1220_v4 }
 0x828   :  { %v1222_v16 = vrot.slane %v1218_v12, 7  ;;  %v1234_v17 = vrot.slane %v1218_v12, 1  ;;  %1253 = vrot.lane.b32.xlu1 %v1218_v12, %s1988_s23 }
 0x829   :  { %v1221_v18 = vrot.slane %v1217_v13, 7  ;;  %v1233_v19 = vrot.slane %v1217_v13, 1  ;;  %1263 = vrot.lane.b32.xlu0 %v1237_v14, %s1989_s3 }
 0x82a   :  { %v1238_v20 = vsel %vm158_vm0, %v1234_v17, %v1231_v10  ;;  %v1226_v21 = vsel %vm145_vm5, %v1222_v16, %v1219_v9 }
 0x82b   :  { %v1236_v25 = vsel %vm158_vm0, %v1232_v5, %v1233_v19  ;;  %v1235_v26 = vsel %vm158_vm0, %v1233_v19, %v1234_v17  ;;  %v1223_v28 = vsel %vm145_vm5, %v1221_v18, %v1222_v16  ;;  %v1224_v29 = vsel %vm145_vm5, %v1220_v4, %v1221_v18  ;;  %v1560_v17 = vld [vmem:[%s2729_s15] ss:$0 sm:$0xff] }
 0x82c   :  { %v1240_v27 = vmul.f32 %v2136_v23, %v1236_v25  ;;  %v1242_v30 = vmul.f32 %v2138_v24, %v1238_v20  ;;  %v1431_v23 = vmul.f32 %v2359_v32, %v2359_v32  ;;  %v1433_v24 = vmul.f32 %v2365_v38, %v2365_v38  ;;  %v1969_v25 = vld [vmem:[%s2736_s26 + $0x8] sm:$0xff] }
 0x82d   :  { %1251 = vrot.lane.b32.xlu0 %v1217_v13, %s1988_s23  ;;  %v1227_v37 = vmul.f32 %v2132_v22, %v1226_v21  ;;  %v1229_v51 = vmul.f32 %v2149_v31, %v1224_v29 }
 0x82e   :  { %1265 = vrot.lane.b32.xlu1 %v1240_v27, %s1989_s3  ;;  %v1970_v27 = vld [vmem:[%s2736_s26] sm:$0xff] }
 0x831   :  { %1267 = vrot.lane.b32.xlu0 %v1235_v26, %s1989_s3 }
 0x832   :  { %1269 = vrot.lane.b32.xlu1 %v1242_v30, %s1989_s3 }
 0x835   :  { %1438 = vrot.lane.b32.xlu0 %v1430_v33, %s1986_s25 }
 0x836   :  { %1440 = vrot.lane.b32.xlu1 %v1431_v23, %s1986_s25 }
 0x839   :  { %1442 = vrot.lane.b32.xlu0 %v1432_v7, %s1986_s25 }
 0x83a   :  { %1444 = vrot.lane.b32.xlu1 %v1433_v24, %s1986_s25 }
 0x896   :  { %v1250_v35 = vpop.permute.xlu1 %1249 }
 0x897   :  { %v1248_v36 = vpop.permute.xlu0 %1247  ;;  %v1276_v49 = vsel %vm377_vm9, %v1225_v15, %v1250_v35 }
 0x898   :  { %v1275_v39 = vsel %vm377_vm9, %v1227_v37, %v1248_v36  ;;  %v1971_v36 = vld [vmem:[%s2736_s26 + $0x18] sm:$0xff] }
 0x89a   :  { %v1254_v42 = vpop.permute.xlu1 %1253 }
 0x89b   :  { %v1264_v41 = vpop.permute.xlu0 %1263  ;;  %v1278_v54 = vsel %vm377_vm9, %v1223_v28, %v1254_v42 }
 0x89c   :  { %v1279_v47 = vsel %vm382_vm10, %v1275_v39, %v1264_v41  ;;  %v1972_v41 = vld [vmem:[%s2736_s26 + $0x10] sm:$0xff] }
 0x89d   :  { %1816 = vmatprep.mubr.msk.f32.mxu0 %vm406_vm11, %v1279_v47 }
 0x89f   :  { %v1252_v48 = vpop.permute.xlu0 %1251 }
 0x8a0   :  { %v1266_v50 = vpop.permute.xlu1 %1265  ;;  %v1277_v22 = vsel %vm377_vm9, %v1229_v51, %v1252_v48 }
 0x8a1   :  { %v1280_v52 = vsel %vm382_vm10, %v1276_v49, %v1266_v50 }
 0x8a2   :  { %1817 = vmatmul.mubr.msk.f32.vlgmr.msra.gmra.mrb[8].mxu0 %vm406_vm11, %v1280_v52 }
 0x8a3   :  { %v1268_v53 = vpop.permute.xlu0 %1267 }
 0x8a4   :  { %v1281_v55 = vsel %vm382_vm10, %v1277_v22, %v1268_v53  ;;  %v1270_v56 = vpop.permute.xlu1 %1269 }
 0x8a5   :  { %v1282_v57 = vsel %vm382_vm10, %v1278_v54, %v1270_v56  ;;  %1819 = vmatprep.mubr.msk.f32.mxu0 %vm406_vm11, %v1281_v55 }
 0x8a6   :  { %1820 = vmatmul.mubr.msk.f32.gmra.mrb[10].mxu0 %vm406_vm11, %v1282_v57 }
 0x8a7   :  { %v1439_v58 = vpop.permute.xlu0 %1438 }
 0x8a8   :  { %v1450_v31 = vadd.f32 %v2373_v44, %v1439_v58  ;;  %v1441_v59 = vpop.permute.xlu1 %1440 }
 0x8a9   :  { %v1451_v60 = vadd.f32 %v2371_v43, %v1441_v59 }
 0x8aa   :  { %v1565_v61 = vadd.f32 -1.0, %v1450_v31 }
 0x8ab   :  { %v1566_v62 = vadd.f32 -1.0, %v1451_v60  ;;  %v1443_v63 = vpop.permute.xlu0 %1442 }
 0x8ac   :  { %v1458_v0 = vsub.f32 %v1565_v61, %v2361_v34  ;;  %v1452_v1 = vadd.f32 %v2379_v46, %v1443_v63  ;;  %v1445_v2 = vpop.permute.xlu1 %1444 }
 0x8ad   :  { %v1459_v3 = vsub.f32 %v1566_v62, %v2359_v32  ;;  %v1453_v4 = vadd.f32 %v2377_v45, %v1445_v2 }
 0x8ae   :  { %v1462_v5 = vmul.f32 0.5, %v1458_v0  ;;  %v1567_v6 = vadd.f32 -1.0, %v1452_v1 }
 0x8af   :  { %v1463_v8 = vmul.f32 0.5, %v1459_v3  ;;  %v1568_v9 = vadd.f32 -1.0, %v1453_v4 }
 0x8b0   :  { %v1460_v44 = vsub.f32 %v1567_v6, %v2367_v40  ;;  %1470 = vrot.lane.b32.xlu0 %v1462_v5, %s1990_s7 }
 0x8b1   :  { %v1461_v43 = vsub.f32 %v1568_v9, %v2365_v38  ;;  %1472 = vrot.lane.b32.xlu1 %v1463_v8, %s1990_s7 }
 0x8b2   :  { %v1464_v34 = vmul.f32 0.5, %v1460_v44 }
 0x8b3   :  { %v1465_v10 = vmul.f32 0.5, %v1461_v43 }
 0x8b4   :  { %1474 = vrot.lane.b32.xlu0 %v1464_v34, %s1990_s7 }
 0x8b5   :  { %1476 = vrot.lane.b32.xlu1 %v1465_v10, %s1990_s7 }
 0x922   :  { %v1471_v32 = vpop.permute.xlu0 %1470 }
 0x923   :  { %v1482_v45 = vsel %vm204_vm7, %v1471_v32, 0.0  ;;  %v1473_v46 = vpop.permute.xlu1 %1472 }
 0x924   :  { %v1483_v11 = vsel %vm204_vm7, %v1473_v46, 0.0 }
 0x925   :  { %v1484_v12 = vadd.f32 %v1483_v11, %v1482_v45 }
 0x926   :  { %v1475_v40 = vpop.permute.xlu0 %1474 }
 0x927   :  { %v1485_v13 = vsel %vm204_vm7, %v1475_v40, 0.0  ;;  %v1477_v14 = vpop.permute.xlu1 %1476 }
 0x928   :  { %v1486_v38 = vadd.f32 %v1485_v13, %v1484_v12  ;;  %v1487_v15 = vsel %vm204_vm7, %v1477_v14, 0.0 }
 0x92a   :  { %v1488_v16 = vadd.f32 %v1487_v15, %v1486_v38 }
 0x92c   :  { %1489 = vadd.xlane.f32.xlu1 %v1488_v16 }
 0x975   :  { %v1818_v18 = vpop.f32.mrb[8].mxu0 }
 0x976   :  { %v1386_v19 = vadd.f32 %v1818_v18, %v1560_v17  ;;  %v1380_v20 = vpop.f32.mrb[9].mxu0 }
 0x977   :  { %v1381_v21 = vadd.f32 %v1560_v17, %v1380_v20 }
 0x978   :  { %1400 = vst.msk [vmem:[%s2730_s16 + $0x8] sm:$0xff] %vm199_vm6, %v1386_v19  ;;  %v1404_v26 = vsub.f32 %v1969_v25, %v1386_v19 }
 0x979   :  { %1399 = vst.msk [vmem:[%s2730_s16] sm:$0xff] %vm199_vm6, %v1381_v21  ;;  %v1403_v28 = vsub.f32 %v1970_v27, %v1381_v21  ;;  %v1821_v29 = vpop.f32.mrb[10].mxu0 }
 0x97a   :  { %v1408_v30 = vmul.f32 %v1404_v26, %v1404_v26  ;;  %v1396_v33 = vadd.f32 %v1821_v29, %v1560_v17  ;;  %v1390_v23 = vpop.f32.mrb[11].mxu0 }
 0x97b   :  { %v1407_v7 = vmul.f32 %v1403_v28, %v1403_v28  ;;  %v1391_v24 = vadd.f32 %v1560_v17, %v1390_v23 }
 0x97c   :  { %v1412_v35 = vsel %vm199_vm6, %v1408_v30, 0.0  ;;  %1402 = vst.msk [vmem:[%s2730_s16 + $0x18] sm:$0xff] %vm199_vm6, %v1396_v33  ;;  %v1406_v37 = vsub.f32 %v1971_v36, %v1396_v33 }
 0x97d   :  { %v1411_v39 = vsel %vm199_vm6, %v1407_v7, 0.0  ;;  %1401 = vst.msk [vmem:[%s2730_s16 + $0x10] sm:$0xff] %vm199_vm6, %v1391_v24  ;;  %v1405_v42 = vsub.f32 %v1972_v41, %v1391_v24 }
 0x97e   :  { %v1413_v47 = vadd.f32 %v1412_v35, %v1411_v39  ;;  %v1410_v48 = vmul.f32 %v1406_v37, %v1406_v37 }
 0x97f   :  { %v1409_v49 = vmul.f32 %v1405_v42, %v1405_v42 }
 0x980   :  { %v1416_v52 = vsel %vm199_vm6, %v1410_v48, 0.0 }
 0x981   :  { %v1414_v50 = vsel %vm199_vm6, %v1409_v49, 0.0 }
 0x982   :  { %v1415_v51 = vadd.f32 %v1414_v50, %v1413_v47 }
 0x984   :  { %v1417_v22 = vadd.f32 %v1416_v52, %v1415_v51 }
 0x986   :  { %1418 = vadd.xlane.f32.xlu0 %v1417_v22 }
 0x9b9   :  { %v1490_v53 = vpop.xlane.xlu1 %1489 }
 0x9ba   :  { %v1491_v54 = vrot.slane %v1490_v53, 4 }
 0x9bc   :  { %v1492_v55 = vadd.f32 %v1491_v54, %v1490_v53 }
 0x9be   :  { %v1493_v56 = vrot.slane %v1492_v55, 2 }
 0x9c0   :  { %v1494_v59 = vadd.f32 %v1493_v56, %v1492_v55 }
 0x9c2   :  { %v1495_v62 = vrot.slane %v1494_v59, 1 }
 0x9c4   :  { %v1496_v1 = vadd.f32 %v1495_v62, %v1494_v59 }
 0xa13   :  { %v1419_v57 = vpop.xlane.xlu0 %1418 }
 0xa14   :  { %v1420_v58 = vrot.slane %v1419_v57, 4 }
 0xa16   :  { %v1421_v31 = vadd.f32 %v1420_v58, %v1419_v57 }
 0xa18   :  { %v1422_v60 = vrot.slane %v1421_v31, 2 }
 0xa1a   :  { %v1423_v61 = vadd.f32 %v1422_v60, %v1421_v31 }
 0xa1c   :  { %v1424_v63 = vrot.slane %v1423_v61, 1 }
 0xa1e   :  { %v1425_v0 = vadd.f32 %v1424_v63, %v1423_v61 }
 0xa20   :  { %1942 = vpush %v1425_v0 }
 0xa21   :  { %1944 = vpush %v1496_v1 }
 0xa51   :  { %s1943_s16 = spop %1942 }
 0xa52   :  { %s1429_s26 = smul.f32 0.00390625, %s1943_s16  ;;  %s1945_s1 = spop %1944 }
 0xa53   :  { %s1500_s20 = smul.f32 0.001953125, %s1945_s1 }
 0xa54   :  { %1502 = sst [smem:[#allocation2]] %s1429_s26 }
 0xa55   :  { %1504 = sst [smem:[#allocation2 + $0x1]] %s1500_s20  ;;  %s1505_s5 = smul.f32 0.0001, %s1500_s20 }
 0xa57   :  { %s1506_s6 = sadd.f32 %s1505_s5, %s1429_s26 }
 0xa59   :  { %1508 = sst [smem:[#allocation2 + $0x2]] %s1506_s6 }
 0xa5a   :  { %1982 = shalt.err (!%p1979_p2)
}
 0xa5b   :  { %s1991_s14 = smov [#allocation2]  }
 0xa5c   :  { %1518 = dma.smem_to_hbm %s1991_s14, 16, %s2731_s17, [#allocation3]  }
 0xa5d   :  { %1983 = dma.done.wait [#allocation3], 16  }
 0xa5e   :  { %1984 = vsyncadd [#allocation3], 4294967280 }
 0xa5f   :  { %1524 = sfence }
 0xa60   :  { %1525 = vsyncpa [#allocation3], 1 }

</bundles_post_ra>
